<compile_context>
chip_gen: v5e
topology: v5e:2x2
jax: 0.10.0
libtpu: 0.0.40
codegen_flags: <defaults>
</compile_context>

<pallas_src>
import jax
import jax.numpy as jnp
import numpy as np
from jax.experimental import pallas as pl
from jax.experimental.pallas import tpu as pltpu


def bottleneck_kernel(x_ref, w1_ref, w2_ref, w3_ref, b1_ref, b2_ref, b3_ref,
                      out_ref, pad_ref):
    Bn, H, W, Cin = x_ref.shape
    P = w1_ref.shape[1]
    Cout = w3_ref.shape[1]
    mm_dtype = pad_ref.dtype
    Wp = pad_ref.shape[2]
    M = Bn * H * W

    # ---- conv1 (1x1, BN1 scale folded into w1) + bias + ReLU ----
    x2 = x_ref[...].reshape(M, Cin)
    y = jnp.dot(x2, w1_ref[...], preferred_element_type=jnp.float32)
    y = jnp.maximum(y + b1_ref[...], 0.0)

    # ---- conv2 (3x3, pad=1, stride=1, BN2 folded) + bias + ReLU ----
    # Zero only the 1-pixel halo of the padded scratch (interior is always
    # fully overwritten below; columns beyond W+1 are never read).
    pad_ref[:, 0:1, :, :] = jnp.zeros((Bn, 1, Wp, P), mm_dtype)
    pad_ref[:, H + 1:H + 2, :, :] = jnp.zeros((Bn, 1, Wp, P), mm_dtype)
    pad_ref[:, 1:H + 1, 0:1, :] = jnp.zeros((Bn, H, 1, P), mm_dtype)
    pad_ref[:, 1:H + 1, W + 1:W + 2, :] = jnp.zeros((Bn, H, 1, P), mm_dtype)
    pad_ref[:, 1:H + 1, 1:W + 1, :] = y.reshape(Bn, H, W, P).astype(mm_dtype)

    # Shift-and-matmul: 9 accumulating K=P MXU matmuls off shifted views of
    # the padded scratch (no materialized im2col patch; MXU has slack since
    # the kernel is HBM-bound at these arithmetic intensities).
    acc = None
    for dy in range(3):
        for dx in range(3):
            slab = pad_ref[:, dy:dy + H, dx:dx + W, :].reshape(M, P)
            prod = jnp.dot(slab, w2_ref[dy, dx],
                           preferred_element_type=jnp.float32)
            acc = prod if acc is None else acc + prod
    y = jnp.maximum(acc + b2_ref[...], 0.0)

    # ---- conv3 (1x1, BN3 folded) + bias + identity + ReLU ----
    y = jnp.dot(y.astype(mm_dtype), w3_ref[...],
                preferred_element_type=jnp.float32)
    y = y + b3_ref[...]
    # Re-read the (bf16) x tile and upcast: residual add stays in f32.
    identity = x_ref[...].reshape(M, Cout).astype(jnp.float32)
    y = jnp.maximum(y + identity, 0.0)
    out_ref[...] = y.reshape(Bn, H, W, Cout).astype(out_ref.dtype)


def bottleneck_pallas(x, w1, w2, w3, s1, b1, s2, b2, s3, b3,
                      *, compute_dtype=jnp.bfloat16):
    N, H, W, Cin = x.shape
    P = w1.shape[1]
    Cout = w3.shape[1]
    assert Cin == Cout, "downsample=None requires inplanes == planes*expansion"
    assert w2.shape == (3, 3, P, P)

    # Fold BN scales into the conv weights (one-time constant transform);
    # only a per-channel bias-add remains in the kernel.
    w1c = (w1 * s1).astype(compute_dtype)                       # (Cin, P)
    w2c = (w2 * s2.reshape(1, 1, 1, P)).astype(compute_dtype)   # (3, 3, P, P)
    w3c = (w3 * s3).astype(compute_dtype)                       # (P, Cout)
    b1c = b1.astype(jnp.float32)
    b2c = b2.astype(jnp.float32)
    b3c = b3.astype(jnp.float32)

    # Activations travel HBM<->VMEM in the compute dtype (bf16 fast path).
    x_io = x.astype(compute_dtype)

    itemsize = jnp.dtype(compute_dtype).itemsize
    sublane_pack = max(1, 4 // itemsize) * 8       # 8 for f32, 16 for bf16
    Wpad = ((W + 2 + sublane_pack - 1) // sublane_pack) * sublane_pack

    # Batch blocking: fatten DMA tiles / matmul M while keeping per-step VMEM
    # within a conservative activation budget.
    per_image = (2 * H * W * (Cin + Cout) * itemsize        # dbl-buffered in/out tiles
                 + (H + 2) * Wpad * P * itemsize            # pad scratch
                 + 6 * H * W * max(P, Cout) * 4)            # live f32 intermediates
    act_budget = 12 * 1024 * 1024
    Bn = 1
    for d in range(1, N + 1):
        if N % d == 0 and d * per_image <= act_budget:
            Bn = d
    grid_n = N // Bn

    weight_bytes = (w1c.size + w2c.size + w3c.size) * itemsize
    bias_bytes = (b1c.size + b2c.size + b3c.size) * 4

    # VMEM budget with headroom, clamped to ~85% of the real chip capacity
    # (v7x has only 64 MiB per TensorCore; v5e/v6e have 128 MiB).
    vmem_bytes = Bn * per_image + 2 * weight_bytes + 2 * bias_bytes
    try:
        vmem_cap = pltpu.get_tpu_info().vmem_capacity_bytes
    except Exception:
        vmem_cap = 64 * 1024 * 1024
    vmem_limit = int(min(max(2 * vmem_bytes, 16 * 1024 * 1024),
                         int(0.85 * vmem_cap)))

    # Advisory cost estimate for XLA scheduling.
    flops = 2 * N * H * W * (Cin * P + 9 * P * P + P * Cout)
    bytes_accessed = int((x_io.size + N * H * W * Cout) * itemsize
                         + weight_bytes + bias_bytes)

    grid_spec = pltpu.PrefetchScalarGridSpec(
        num_scalar_prefetch=0,
        grid=(grid_n,),
        in_specs=[
            pl.BlockSpec((Bn, H, W, Cin), lambda n: (n, 0, 0, 0)),
            pl.BlockSpec((Cin, P), lambda n: (0, 0)),
            pl.BlockSpec((3, 3, P, P), lambda n: (0, 0, 0, 0)),
            pl.BlockSpec((P, Cout), lambda n: (0, 0)),
            pl.BlockSpec((1, P), lambda n: (0, 0)),
            pl.BlockSpec((1, P), lambda n: (0, 0)),
            pl.BlockSpec((1, Cout), lambda n: (0, 0)),
        ],
        out_specs=pl.BlockSpec((Bn, H, W, Cout), lambda n: (n, 0, 0, 0)),
        scratch_shapes=[
            pltpu.VMEM((Bn, H + 2, Wpad, P), compute_dtype),  # halo-padded conv2 input
        ],
    )

    return pl.pallas_call(
        bottleneck_kernel,
        out_shape=jax.ShapeDtypeStruct((N, H, W, Cout), compute_dtype),
        grid_spec=grid_spec,
        compiler_params=pltpu.CompilerParams(
            dimension_semantics=("parallel",),
            vmem_limit_bytes=vmem_limit,
        ),
        cost_estimate=pl.CostEstimate(
            flops=flops, transcendentals=0, bytes_accessed=bytes_accessed),
    )(x_io, w1c, w2c, w3c, b1c, b2c, b3c)


def bottleneck_ref(x, w1, w2, w3, s1, b1, s2, b2, s3, b3,
                   mm_dtype=jnp.float32):
    # Pure-JAX reference (NHWC / HWIO) mirroring the kernel's quantization
    # points: BN scales folded into weights (then cast to mm_dtype), x cast
    # to mm_dtype at entry, f32 accumulation/elementwise, output in mm_dtype.
    w1f = (w1 * s1).astype(mm_dtype)
    w2f = (w2 * s2.reshape(1, 1, 1, -1)).astype(mm_dtype)
    w3f = (w3 * s3).astype(mm_dtype)
    x_io = x.astype(mm_dtype)

    y = jnp.einsum('nhwc,co->nhwo', x_io, w1f,
                   preferred_element_type=jnp.float32)
    y = jnp.maximum(y + b1, 0.0)
    y = jax.lax.conv_general_dilated(
        y.astype(mm_dtype), w2f, window_strides=(1, 1), padding='SAME',
        dimension_numbers=('NHWC', 'HWIO', 'NHWC'),
        preferred_element_type=jnp.float32)
    y = jnp.maximum(y + b2, 0.0)
    y = jnp.einsum('nhwc,co->nhwo', y.astype(mm_dtype), w3f,
                   preferred_element_type=jnp.float32)
    y = y + b3
    y = jnp.maximum(y + x_io.astype(jnp.float32), 0.0)
    return y.astype(mm_dtype).astype(jnp.float32)


def fold_bn(gamma, beta, mean, var, eps=1e-5):
    scale = gamma / jnp.sqrt(var + eps)
    bias = beta - mean * scale
    # keep 2D (1, C) so they broadcast cleanly against (rows, C) in-kernel
    return scale[None, :], bias[None, :]


if __name__ == "__main__":
    key = jax.random.PRNGKey(0)
    N, H, W = 2, 8, 8
    planes = 4
    expansion = 4
    inplanes = planes * expansion  # 16 -> identity add is valid w/o downsample

    keys = jax.random.split(key, 16)
    x = jax.random.normal(keys[0], (N, H, W, inplanes), jnp.float32)

    w1 = jax.random.normal(keys[1], (inplanes, planes), jnp.float32) * 0.1
    w2 = jax.random.normal(keys[2], (3, 3, planes, planes), jnp.float32) * 0.1
    w3 = jax.random.normal(keys[3], (planes, planes * expansion), jnp.float32) * 0.1

    def bn_params(k, c):
        kg, kb, km, kv = jax.random.split(k, 4)
        gamma = 1.0 + 0.1 * jax.random.normal(kg, (c,), jnp.float32)
        beta = 0.1 * jax.random.normal(kb, (c,), jnp.float32)
        mean = 0.1 * jax.random.normal(km, (c,), jnp.float32)
        var = jnp.abs(jax.random.normal(kv, (c,), jnp.float32)) + 0.5
        return gamma, beta, mean, var

    s1, b1 = fold_bn(*bn_params(keys[4], planes))
    s2, b2 = fold_bn(*bn_params(keys[5], planes))
    s3, b3 = fold_bn(*bn_params(keys[6], planes * expansion))

    args = (x, w1, w2, w3, s1, b1, s2, b2, s3, b3)

    # 1) exact-semantics check: f32 compute/IO path vs f32 reference
    out_f32 = jax.block_until_ready(
        bottleneck_pallas(*args, compute_dtype=jnp.float32))
    ref_f32 = bottleneck_ref(*args, mm_dtype=jnp.float32)
    np.testing.assert_allclose(np.asarray(out_f32.astype(jnp.float32)),
                               np.asarray(ref_f32), rtol=1e-4, atol=1e-4)

    # 2) fast path: bf16 activations + bf16 matmuls (f32 accumulation)
    out_bf16 = jax.block_until_ready(
        bottleneck_pallas(*args, compute_dtype=jnp.bfloat16))
    ref_bf16 = bottleneck_ref(*args, mm_dtype=jnp.bfloat16)
    np.testing.assert_allclose(np.asarray(out_bf16.astype(jnp.float32)),
                               np.asarray(ref_bf16), rtol=2e-2, atol=2e-2)

    print("KERNEL_OK")
</pallas_src>

<mosaic_0001>
module attributes {stable_mosaic.version = 11 : i64} {
  func.func @bottleneck_kernel(%arg0: i32, %arg1: memref<2x8x8x16xf32, #tpu.memory_space<vmem>>, %arg2: memref<16x4xf32, #tpu.memory_space<vmem>>, %arg3: memref<3x3x4x4xf32, #tpu.memory_space<vmem>>, %arg4: memref<4x16xf32, #tpu.memory_space<vmem>>, %arg5: memref<1x4xf32, #tpu.memory_space<vmem>>, %arg6: memref<1x4xf32, #tpu.memory_space<vmem>>, %arg7: memref<1x16xf32, #tpu.memory_space<vmem>>, %arg8: memref<2x8x8x16xf32, #tpu.memory_space<vmem>>, %arg9: memref<2x10x16x4xf32, #tpu.memory_space<vmem>>) attributes {dimension_semantics = [#tpu.dimension_semantics<parallel>], iteration_bounds = array<i64: 1>, scalar_prefetch = 0 : i64, scratch_operands = 1 : i64, tpu.core_type = #tpu.core_type<tc>, window_params = [{transform_indices = @transform_0, window_bounds = array<i64: 2, 8, 8, 16>}, {pipeline_mode = #tpu.pipeline_mode<synchronous>, transform_indices = @transform_1, window_bounds = array<i64: 16, 4>}, {pipeline_mode = #tpu.pipeline_mode<synchronous>, transform_indices = @transform_2, window_bounds = array<i64: 3, 3, 4, 4>}, {pipeline_mode = #tpu.pipeline_mode<synchronous>, transform_indices = @transform_3, window_bounds = array<i64: 4, 16>}, {pipeline_mode = #tpu.pipeline_mode<synchronous>, transform_indices = @transform_4, window_bounds = array<i64: 1, 4>}, {pipeline_mode = #tpu.pipeline_mode<synchronous>, transform_indices = @transform_5, window_bounds = array<i64: 1, 4>}, {pipeline_mode = #tpu.pipeline_mode<synchronous>, transform_indices = @transform_6, window_bounds = array<i64: 1, 16>}, {transform_indices = @transform_7, window_bounds = array<i64: 2, 8, 8, 16>}]} {
    %c0 = arith.constant 0 : index
    %c0_0 = arith.constant 0 : index
    %c0_1 = arith.constant 0 : index
    %c0_2 = arith.constant 0 : index
    %0 = vector.load %arg1[%c0, %c0_0, %c0_1, %c0_2] : memref<2x8x8x16xf32, #tpu.memory_space<vmem>>, vector<2x8x8x16xf32>
    %1 = vector.shape_cast %0 : vector<2x8x8x16xf32> to vector<128x16xf32>
    %c0_3 = arith.constant 0 : index
    %c0_4 = arith.constant 0 : index
    %2 = vector.load %arg2[%c0_3, %c0_4] : memref<16x4xf32, #tpu.memory_space<vmem>>, vector<16x4xf32>
    %cst = arith.constant dense<0.000000e+00> : vector<128x4xf32>
    %3 = tpu.matmul %1, %2, %cst {dimension_numbers = #tpu.dot_dimension_numbers<[1], [0], [0], [1], [0, 0, 1, 1], [], []>} : vector<128x16xf32>, vector<16x4xf32>, vector<128x4xf32> -> vector<128x4xf32>
    %c0_5 = arith.constant 0 : index
    %c0_6 = arith.constant 0 : index
    %4 = vector.load %arg5[%c0_5, %c0_6] : memref<1x4xf32, #tpu.memory_space<vmem>>, vector<1x4xf32>
    %5 = vector.broadcast %4 : vector<1x4xf32> to vector<128x4xf32>
    %6 = arith.addf %3, %5 : vector<128x4xf32>
    %cst_7 = arith.constant 0.000000e+00 : f32
    %7 = vector.broadcast %cst_7 : f32 to vector<128x4xf32>
    %8 = arith.maximumf %6, %7 : vector<128x4xf32>
    %cst_8 = arith.constant 0.000000e+00 : f32
    %9 = vector.broadcast %cst_8 : f32 to vector<2x1x16x4xf32>
    %c0_9 = arith.constant 0 : index
    %c0_10 = arith.constant 0 : index
    %c0_11 = arith.constant 0 : index
    %c0_12 = arith.constant 0 : index
    %10 = vector.load %arg9[%c0_9, %c0_10, %c0_11, %c0_12] : memref<2x10x16x4xf32, #tpu.memory_space<vmem>>, vector<2x1x16x4xf32>
    tpu.vector_store %arg9[%c0_9, %c0_10, %c0_11, %c0_12], %9 {strides = array<i32>} : memref<2x10x16x4xf32, #tpu.memory_space<vmem>>, vector<2x1x16x4xf32>,
    %cst_13 = arith.constant 0.000000e+00 : f32
    %11 = vector.broadcast %cst_13 : f32 to vector<2x1x16x4xf32>
    %c0_14 = arith.constant 0 : index
    %c9 = arith.constant 9 : index
    %c0_15 = arith.constant 0 : index
    %c0_16 = arith.constant 0 : index
    %12 = vector.load %arg9[%c0_14, %c9, %c0_15, %c0_16] : memref<2x10x16x4xf32, #tpu.memory_space<vmem>>, vector<2x1x16x4xf32>
    tpu.vector_store %arg9[%c0_14, %c9, %c0_15, %c0_16], %11 {strides = array<i32>} : memref<2x10x16x4xf32, #tpu.memory_space<vmem>>, vector<2x1x16x4xf32>,
    %cst_17 = arith.constant 0.000000e+00 : f32
    %13 = vector.broadcast %cst_17 : f32 to vector<2x8x1x4xf32>
    %c0_18 = arith.constant 0 : index
    %c1 = arith.constant 1 : index
    %c0_19 = arith.constant 0 : index
    %c0_20 = arith.constant 0 : index
    %14 = vector.load %arg9[%c0_18, %c1, %c0_19, %c0_20] : memref<2x10x16x4xf32, #tpu.memory_space<vmem>>, vector<2x8x1x4xf32>
    tpu.vector_store %arg9[%c0_18, %c1, %c0_19, %c0_20], %13 {strides = array<i32>} : memref<2x10x16x4xf32, #tpu.memory_space<vmem>>, vector<2x8x1x4xf32>,
    %cst_21 = arith.constant 0.000000e+00 : f32
    %15 = vector.broadcast %cst_21 : f32 to vector<2x8x1x4xf32>
    %c0_22 = arith.constant 0 : index
    %c1_23 = arith.constant 1 : index
    %c9_24 = arith.constant 9 : index
    %c0_25 = arith.constant 0 : index
    %16 = vector.load %arg9[%c0_22, %c1_23, %c9_24, %c0_25] : memref<2x10x16x4xf32, #tpu.memory_space<vmem>>, vector<2x8x1x4xf32>
    tpu.vector_store %arg9[%c0_22, %c1_23, %c9_24, %c0_25], %15 {strides = array<i32>} : memref<2x10x16x4xf32, #tpu.memory_space<vmem>>, vector<2x8x1x4xf32>,
    %17 = vector.shape_cast %8 : vector<128x4xf32> to vector<2x8x8x4xf32>
    %c0_26 = arith.constant 0 : index
    %c1_27 = arith.constant 1 : index
    %c1_28 = arith.constant 1 : index
    %c0_29 = arith.constant 0 : index
    %18 = vector.load %arg9[%c0_26, %c1_27, %c1_28, %c0_29] : memref<2x10x16x4xf32, #tpu.memory_space<vmem>>, vector<2x8x8x4xf32>
    tpu.vector_store %arg9[%c0_26, %c1_27, %c1_28, %c0_29], %17 {strides = array<i32>} : memref<2x10x16x4xf32, #tpu.memory_space<vmem>>, vector<2x8x8x4xf32>,
    %c0_30 = arith.constant 0 : index
    %c0_31 = arith.constant 0 : index
    %c0_32 = arith.constant 0 : index
    %c0_33 = arith.constant 0 : index
    %19 = vector.load %arg9[%c0_30, %c0_31, %c0_32, %c0_33] : memref<2x10x16x4xf32, #tpu.memory_space<vmem>>, vector<2x8x8x4xf32>
    %20 = vector.shape_cast %19 : vector<2x8x8x4xf32> to vector<128x4xf32>
    %c0_34 = arith.constant 0 : index
    %c0_35 = arith.constant 0 : index
    %c0_36 = arith.constant 0 : index
    %c0_37 = arith.constant 0 : index
    %21 = vector.load %arg3[%c0_34, %c0_35, %c0_36, %c0_37] : memref<3x3x4x4xf32, #tpu.memory_space<vmem>>, vector<1x1x4x4xf32>
    %22 = vector.shape_cast %21 : vector<1x1x4x4xf32> to vector<4x4xf32>
    %cst_38 = arith.constant dense<0.000000e+00> : vector<128x4xf32>
    %23 = tpu.matmul %20, %22, %cst_38 {dimension_numbers = #tpu.dot_dimension_numbers<[1], [0], [0], [1], [0, 0, 1, 1], [], []>} : vector<128x4xf32>, vector<4x4xf32>, vector<128x4xf32> -> vector<128x4xf32>
    %c0_39 = arith.constant 0 : index
    %c0_40 = arith.constant 0 : index
    %c1_41 = arith.constant 1 : index
    %c0_42 = arith.constant 0 : index
    %24 = vector.load %arg9[%c0_39, %c0_40, %c1_41, %c0_42] : memref<2x10x16x4xf32, #tpu.memory_space<vmem>>, vector<2x8x8x4xf32>
    %25 = vector.shape_cast %24 : vector<2x8x8x4xf32> to vector<128x4xf32>
    %c0_43 = arith.constant 0 : index
    %c1_44 = arith.constant 1 : index
    %c0_45 = arith.constant 0 : index
    %c0_46 = arith.constant 0 : index
    %26 = vector.load %arg3[%c0_43, %c1_44, %c0_45, %c0_46] : memref<3x3x4x4xf32, #tpu.memory_space<vmem>>, vector<1x1x4x4xf32>
    %27 = vector.shape_cast %26 : vector<1x1x4x4xf32> to vector<4x4xf32>
    %cst_47 = arith.constant dense<0.000000e+00> : vector<128x4xf32>
    %28 = tpu.matmul %25, %27, %cst_47 {dimension_numbers = #tpu.dot_dimension_numbers<[1], [0], [0], [1], [0, 0, 1, 1], [], []>} : vector<128x4xf32>, vector<4x4xf32>, vector<128x4xf32> -> vector<128x4xf32>
    %29 = arith.addf %23, %28 : vector<128x4xf32>
    %c0_48 = arith.constant 0 : index
    %c0_49 = arith.constant 0 : index
    %c2 = arith.constant 2 : index
    %c0_50 = arith.constant 0 : index
    %30 = vector.load %arg9[%c0_48, %c0_49, %c2, %c0_50] : memref<2x10x16x4xf32, #tpu.memory_space<vmem>>, vector<2x8x8x4xf32>
    %31 = vector.shape_cast %30 : vector<2x8x8x4xf32> to vector<128x4xf32>
    %c0_51 = arith.constant 0 : index
    %c2_52 = arith.constant 2 : index
    %c0_53 = arith.constant 0 : index
    %c0_54 = arith.constant 0 : index
    %32 = vector.load %arg3[%c0_51, %c2_52, %c0_53, %c0_54] : memref<3x3x4x4xf32, #tpu.memory_space<vmem>>, vector<1x1x4x4xf32>
    %33 = vector.shape_cast %32 : vector<1x1x4x4xf32> to vector<4x4xf32>
    %cst_55 = arith.constant dense<0.000000e+00> : vector<128x4xf32>
    %34 = tpu.matmul %31, %33, %cst_55 {dimension_numbers = #tpu.dot_dimension_numbers<[1], [0], [0], [1], [0, 0, 1, 1], [], []>} : vector<128x4xf32>, vector<4x4xf32>, vector<128x4xf32> -> vector<128x4xf32>
    %35 = arith.addf %29, %34 : vector<128x4xf32>
    %c0_56 = arith.constant 0 : index
    %c1_57 = arith.constant 1 : index
    %c0_58 = arith.constant 0 : index
    %c0_59 = arith.constant 0 : index
    %36 = vector.load %arg9[%c0_56, %c1_57, %c0_58, %c0_59] : memref<2x10x16x4xf32, #tpu.memory_space<vmem>>, vector<2x8x8x4xf32>
    %37 = vector.shape_cast %36 : vector<2x8x8x4xf32> to vector<128x4xf32>
    %c1_60 = arith.constant 1 : index
    %c0_61 = arith.constant 0 : index
    %c0_62 = arith.constant 0 : index
    %c0_63 = arith.constant 0 : index
    %38 = vector.load %arg3[%c1_60, %c0_61, %c0_62, %c0_63] : memref<3x3x4x4xf32, #tpu.memory_space<vmem>>, vector<1x1x4x4xf32>
    %39 = vector.shape_cast %38 : vector<1x1x4x4xf32> to vector<4x4xf32>
    %cst_64 = arith.constant dense<0.000000e+00> : vector<128x4xf32>
    %40 = tpu.matmul %37, %39, %cst_64 {dimension_numbers = #tpu.dot_dimension_numbers<[1], [0], [0], [1], [0, 0, 1, 1], [], []>} : vector<128x4xf32>, vector<4x4xf32>, vector<128x4xf32> -> vector<128x4xf32>
    %41 = arith.addf %35, %40 : vector<128x4xf32>
    %c0_65 = arith.constant 0 : index
    %c1_66 = arith.constant 1 : index
    %c1_67 = arith.constant 1 : index
    %c0_68 = arith.constant 0 : index
    %42 = vector.load %arg9[%c0_65, %c1_66, %c1_67, %c0_68] : memref<2x10x16x4xf32, #tpu.memory_space<vmem>>, vector<2x8x8x4xf32>
    %43 = vector.shape_cast %42 : vector<2x8x8x4xf32> to vector<128x4xf32>
    %c1_69 = arith.constant 1 : index
    %c1_70 = arith.constant 1 : index
    %c0_71 = arith.constant 0 : index
    %c0_72 = arith.constant 0 : index
    %44 = vector.load %arg3[%c1_69, %c1_70, %c0_71, %c0_72] : memref<3x3x4x4xf32, #tpu.memory_space<vmem>>, vector<1x1x4x4xf32>
    %45 = vector.shape_cast %44 : vector<1x1x4x4xf32> to vector<4x4xf32>
    %cst_73 = arith.constant dense<0.000000e+00> : vector<128x4xf32>
    %46 = tpu.matmul %43, %45, %cst_73 {dimension_numbers = #tpu.dot_dimension_numbers<[1], [0], [0], [1], [0, 0, 1, 1], [], []>} : vector<128x4xf32>, vector<4x4xf32>, vector<128x4xf32> -> vector<128x4xf32>
    %47 = arith.addf %41, %46 : vector<128x4xf32>
    %c0_74 = arith.constant 0 : index
    %c1_75 = arith.constant 1 : index
    %c2_76 = arith.constant 2 : index
    %c0_77 = arith.constant 0 : index
    %48 = vector.load %arg9[%c0_74, %c1_75, %c2_76, %c0_77] : memref<2x10x16x4xf32, #tpu.memory_space<vmem>>, vector<2x8x8x4xf32>
    %49 = vector.shape_cast %48 : vector<2x8x8x4xf32> to vector<128x4xf32>
    %c1_78 = arith.constant 1 : index
    %c2_79 = arith.constant 2 : index
    %c0_80 = arith.constant 0 : index
    %c0_81 = arith.constant 0 : index
    %50 = vector.load %arg3[%c1_78, %c2_79, %c0_80, %c0_81] : memref<3x3x4x4xf32, #tpu.memory_space<vmem>>, vector<1x1x4x4xf32>
    %51 = vector.shape_cast %50 : vector<1x1x4x4xf32> to vector<4x4xf32>
    %cst_82 = arith.constant dense<0.000000e+00> : vector<128x4xf32>
    %52 = tpu.matmul %49, %51, %cst_82 {dimension_numbers = #tpu.dot_dimension_numbers<[1], [0], [0], [1], [0, 0, 1, 1], [], []>} : vector<128x4xf32>, vector<4x4xf32>, vector<128x4xf32> -> vector<128x4xf32>
    %53 = arith.addf %47, %52 : vector<128x4xf32>
    %c0_83 = arith.constant 0 : index
    %c2_84 = arith.constant 2 : index
    %c0_85 = arith.constant 0 : index
    %c0_86 = arith.constant 0 : index
    %54 = vector.load %arg9[%c0_83, %c2_84, %c0_85, %c0_86] : memref<2x10x16x4xf32, #tpu.memory_space<vmem>>, vector<2x8x8x4xf32>
    %55 = vector.shape_cast %54 : vector<2x8x8x4xf32> to vector<128x4xf32>
    %c2_87 = arith.constant 2 : index
    %c0_88 = arith.constant 0 : index
    %c0_89 = arith.constant 0 : index
    %c0_90 = arith.constant 0 : index
    %56 = vector.load %arg3[%c2_87, %c0_88, %c0_89, %c0_90] : memref<3x3x4x4xf32, #tpu.memory_space<vmem>>, vector<1x1x4x4xf32>
    %57 = vector.shape_cast %56 : vector<1x1x4x4xf32> to vector<4x4xf32>
    %cst_91 = arith.constant dense<0.000000e+00> : vector<128x4xf32>
    %58 = tpu.matmul %55, %57, %cst_91 {dimension_numbers = #tpu.dot_dimension_numbers<[1], [0], [0], [1], [0, 0, 1, 1], [], []>} : vector<128x4xf32>, vector<4x4xf32>, vector<128x4xf32> -> vector<128x4xf32>
    %59 = arith.addf %53, %58 : vector<128x4xf32>
    %c0_92 = arith.constant 0 : index
    %c2_93 = arith.constant 2 : index
    %c1_94 = arith.constant 1 : index
    %c0_95 = arith.constant 0 : index
    %60 = vector.load %arg9[%c0_92, %c2_93, %c1_94, %c0_95] : memref<2x10x16x4xf32, #tpu.memory_space<vmem>>, vector<2x8x8x4xf32>
    %61 = vector.shape_cast %60 : vector<2x8x8x4xf32> to vector<128x4xf32>
    %c2_96 = arith.constant 2 : index
    %c1_97 = arith.constant 1 : index
    %c0_98 = arith.constant 0 : index
    %c0_99 = arith.constant 0 : index
    %62 = vector.load %arg3[%c2_96, %c1_97, %c0_98, %c0_99] : memref<3x3x4x4xf32, #tpu.memory_space<vmem>>, vector<1x1x4x4xf32>
    %63 = vector.shape_cast %62 : vector<1x1x4x4xf32> to vector<4x4xf32>
    %cst_100 = arith.constant dense<0.000000e+00> : vector<128x4xf32>
    %64 = tpu.matmul %61, %63, %cst_100 {dimension_numbers = #tpu.dot_dimension_numbers<[1], [0], [0], [1], [0, 0, 1, 1], [], []>} : vector<128x4xf32>, vector<4x4xf32>, vector<128x4xf32> -> vector<128x4xf32>
    %65 = arith.addf %59, %64 : vector<128x4xf32>
    %c0_101 = arith.constant 0 : index
    %c2_102 = arith.constant 2 : index
    %c2_103 = arith.constant 2 : index
    %c0_104 = arith.constant 0 : index
    %66 = vector.load %arg9[%c0_101, %c2_102, %c2_103, %c0_104] : memref<2x10x16x4xf32, #tpu.memory_space<vmem>>, vector<2x8x8x4xf32>
    %67 = vector.shape_cast %66 : vector<2x8x8x4xf32> to vector<128x4xf32>
    %c2_105 = arith.constant 2 : index
    %c2_106 = arith.constant 2 : index
    %c0_107 = arith.constant 0 : index
    %c0_108 = arith.constant 0 : index
    %68 = vector.load %arg3[%c2_105, %c2_106, %c0_107, %c0_108] : memref<3x3x4x4xf32, #tpu.memory_space<vmem>>, vector<1x1x4x4xf32>
    %69 = vector.shape_cast %68 : vector<1x1x4x4xf32> to vector<4x4xf32>
    %cst_109 = arith.constant dense<0.000000e+00> : vector<128x4xf32>
    %70 = tpu.matmul %67, %69, %cst_109 {dimension_numbers = #tpu.dot_dimension_numbers<[1], [0], [0], [1], [0, 0, 1, 1], [], []>} : vector<128x4xf32>, vector<4x4xf32>, vector<128x4xf32> -> vector<128x4xf32>
    %71 = arith.addf %65, %70 : vector<128x4xf32>
    %c0_110 = arith.constant 0 : index
    %c0_111 = arith.constant 0 : index
    %72 = vector.load %arg6[%c0_110, %c0_111] : memref<1x4xf32, #tpu.memory_space<vmem>>, vector<1x4xf32>
    %73 = vector.broadcast %72 : vector<1x4xf32> to vector<128x4xf32>
    %74 = arith.addf %71, %73 : vector<128x4xf32>
    %cst_112 = arith.constant 0.000000e+00 : f32
    %75 = vector.broadcast %cst_112 : f32 to vector<128x4xf32>
    %76 = arith.maximumf %74, %75 : vector<128x4xf32>
    %c0_113 = arith.constant 0 : index
    %c0_114 = arith.constant 0 : index
    %77 = vector.load %arg4[%c0_113, %c0_114] : memref<4x16xf32, #tpu.memory_space<vmem>>, vector<4x16xf32>
    %cst_115 = arith.constant dense<0.000000e+00> : vector<128x16xf32>
    %78 = tpu.matmul %76, %77, %cst_115 {dimension_numbers = #tpu.dot_dimension_numbers<[1], [0], [0], [1], [0, 0, 1, 1], [], []>} : vector<128x4xf32>, vector<4x16xf32>, vector<128x16xf32> -> vector<128x16xf32>
    %c0_116 = arith.constant 0 : index
    %c0_117 = arith.constant 0 : index
    %79 = vector.load %arg7[%c0_116, %c0_117] : memref<1x16xf32, #tpu.memory_space<vmem>>, vector<1x16xf32>
    %80 = vector.broadcast %79 : vector<1x16xf32> to vector<128x16xf32>
    %81 = arith.addf %78, %80 : vector<128x16xf32>
    %c0_118 = arith.constant 0 : index
    %c0_119 = arith.constant 0 : index
    %c0_120 = arith.constant 0 : index
    %c0_121 = arith.constant 0 : index
    %82 = vector.load %arg1[%c0_118, %c0_119, %c0_120, %c0_121] : memref<2x8x8x16xf32, #tpu.memory_space<vmem>>, vector<2x8x8x16xf32>
    %83 = vector.shape_cast %82 : vector<2x8x8x16xf32> to vector<128x16xf32>
    %84 = arith.addf %81, %83 : vector<128x16xf32>
    %cst_122 = arith.constant 0.000000e+00 : f32
    %85 = vector.broadcast %cst_122 : f32 to vector<128x16xf32>
    %86 = arith.maximumf %84, %85 : vector<128x16xf32>
    %87 = vector.shape_cast %86 : vector<128x16xf32> to vector<2x8x8x16xf32>
    %c0_123 = arith.constant 0 : index
    %c0_124 = arith.constant 0 : index
    %c0_125 = arith.constant 0 : index
    %c0_126 = arith.constant 0 : index
    %88 = vector.load %arg8[%c0_123, %c0_124, %c0_125, %c0_126] : memref<2x8x8x16xf32, #tpu.memory_space<vmem>>, vector<2x8x8x16xf32>
    tpu.vector_store %arg8[%c0_123, %c0_124, %c0_125, %c0_126], %87 {strides = array<i32>} : memref<2x8x8x16xf32, #tpu.memory_space<vmem>>, vector<2x8x8x16xf32>,
    return
  }
  func.func @transform_0(%arg0: i32) -> (i32, i32, i32, i32) {
    %c0_i32 = arith.constant 0 : i32
    %c0_i32_0 = arith.constant 0 : i32
    %c0_i32_1 = arith.constant 0 : i32
    %c0_i32_2 = arith.constant 0 : i32
    return %arg0, %c0_i32, %c0_i32_0, %c0_i32_1 : i32, i32, i32, i32
  }
  func.func @transform_1(%arg0: i32) -> (i32, i32) {
    %c0_i32 = arith.constant 0 : i32
    %c0_i32_0 = arith.constant 0 : i32
    %c0_i32_1 = arith.constant 0 : i32
    return %c0_i32, %c0_i32_0 : i32, i32
  }
  func.func @transform_2(%arg0: i32) -> (i32, i32, i32, i32) {
    %c0_i32 = arith.constant 0 : i32
    %c0_i32_0 = arith.constant 0 : i32
    %c0_i32_1 = arith.constant 0 : i32
    %c0_i32_2 = arith.constant 0 : i32
    %c0_i32_3 = arith.constant 0 : i32
    return %c0_i32, %c0_i32_0, %c0_i32_1, %c0_i32_2 : i32, i32, i32, i32
  }
  func.func @transform_3(%arg0: i32) -> (i32, i32) {
    %c0_i32 = arith.constant 0 : i32
    %c0_i32_0 = arith.constant 0 : i32
    %c0_i32_1 = arith.constant 0 : i32
    return %c0_i32, %c0_i32_0 : i32, i32
  }
  func.func @transform_4(%arg0: i32) -> (i32, i32) {
    %c0_i32 = arith.constant 0 : i32
    %c0_i32_0 = arith.constant 0 : i32
    %c0_i32_1 = arith.constant 0 : i32
    return %c0_i32, %c0_i32_0 : i32, i32
  }
  func.func @transform_5(%arg0: i32) -> (i32, i32) {
    %c0_i32 = arith.constant 0 : i32
    %c0_i32_0 = arith.constant 0 : i32
    %c0_i32_1 = arith.constant 0 : i32
    return %c0_i32, %c0_i32_0 : i32, i32
  }
  func.func @transform_6(%arg0: i32) -> (i32, i32) {
    %c0_i32 = arith.constant 0 : i32
    %c0_i32_0 = arith.constant 0 : i32
    %c0_i32_1 = arith.constant 0 : i32
    return %c0_i32, %c0_i32_0 : i32, i32
  }
  func.func @transform_7(%arg0: i32) -> (i32, i32, i32, i32) {
    %c0_i32 = arith.constant 0 : i32
    %c0_i32_0 = arith.constant 0 : i32
    %c0_i32_1 = arith.constant 0 : i32
    %c0_i32_2 = arith.constant 0 : i32
    return %arg0, %c0_i32, %c0_i32_0, %c0_i32_1 : i32, i32, i32, i32
  }
}

</mosaic_0001>

<bundles_post_ra>
// kernel: tpu_custom_call.1
= control target key start
LH: loop header
LB: loop body
LE: loop exit
PB: predicated region body
PF: predicated region fallthrough
CT: control target
= control target key end

     0   :  { %12 = vsyncpa [#allocation4], 0  ;;  %s2876_s0 = inlined_call_operand.hbm [shape: f32[2,8,8,16], index: 0, kind: input, shape index: {}]   ;;  %s2877_s1 = inlined_call_operand.vmem [shape: f32[16,4], index: 1, kind: input, shape index: {}]   ;;  %s2878_s2 = inlined_call_operand.hbm [shape: f32[3,3,4,4], index: 2, kind: input, shape index: {}]   ;;  %s2879_s3 = inlined_call_operand.vmem [shape: f32[4,16], index: 3, kind: input, shape index: {}]   ;;  %s2880_s4 = inlined_call_operand.vmem [shape: f32[1,4], index: 4, kind: input, shape index: {}]   ;;  %s2881_s5 = inlined_call_operand.vmem [shape: f32[1,4], index: 5, kind: input, shape index: {}]   ;;  %s2882_s6 = inlined_call_operand.vmem [shape: f32[1,16], index: 6, kind: input, shape index: {}]   ;;  %s2883_s7 = inlined_call_operand.hbm [shape: f32[2,8,8,16], index: 7, kind: output, shape index: {}]  }
   0x1   :  { %13 = vsyncpa [#allocation7], 0 }
   0x2   :  { %14 = vsyncpa [#allocation5], 0  ;;  %s19_s26 = sshll.u32 %s2876_s0, 4  ;;  %s2109_s27 = smov [#allocation3]   ;;  %s20_s26 = int_to_ptr.hbm [resolvable:$true] %s19_s26 }
   0x3   :  { %s21_s28 = sshll.u32 %s2109_s27, 4  ;;  %s34_s8 = sshll.u32 %s2878_s2, 4  ;;  %s22_s28 = int_to_ptr.vmem [resolvable:$true] %s21_s28  ;;  %s35_s8 = int_to_ptr.hbm [resolvable:$true] %s34_s8 }
   0x4   :  { %s2110_s9 = smov 128   ;;  %s2111_s10 = smov 8  }
   0x5   :  { %27 = dma.hbm_to_vmem [thread:$0]  %s20_s26, 2048, %s22_s28, [#allocation4], %s2110_s9, %s2110_s9, %s2111_s10  }
   0x6   :  { %s2112_s11 = smov [#allocation6]   ;;  %s2113_s13 = smov 64  }
   0x7   :  { %s36_s12 = sshll.u32 %s2112_s11, 4  ;;  %s2114_s0 = smov 4   ;;  %s37_s12 = int_to_ptr.vmem [resolvable:$true] %s36_s12 }
   0x8   :  { %42 = dma.hbm_to_vmem [thread:$0]  %s35_s8, 576, %s37_s12, [#allocation7], %s2113_s13, %s2113_s13, %s2114_s0  }
   0x9   :  { %2103 = dma.done.wait [#allocation4], 2048  }
   0xa   :  { %2104 = vsyncadd [#allocation4], 4294965248 }
   0xb   :  { %2105 = dma.done.wait [#allocation7], 576  }
   0xc   :  { %2106 = vsyncadd [#allocation7], 4294966720  ;;  %v76_v0 = vld [vmem:[%s2877_s1 + $0x8] sm:$0xff]  ;;  %v75_v1 = vld [vmem:[%s2877_s1] sm:$0xff]  ;;  %vm81_vm0 = vcmask 130048   ;;  %vm211_vm1 = vcmask 31744  }
   0xd   :  { %144 = vmatpush.msra.mxu0 %v76_v0  ;;  %v59_v2 = vld [vmem:[#allocation3] sm:$0xff]  ;;  %v60_v3 = vld [vmem:[#allocation3 + $0x8] sm:$0xff]  ;;  %v61_v4 = vld [vmem:[#allocation3 + $0x10] sm:$0xff]  ;;  %v2115_v14 = vmov 0.0   ;;  %vm354_vm2 = vcmask 1043456   ;;  %vm222_vm3 = vcmask 24576  }
   0xe   :  { %v62_v5 = vld [vmem:[#allocation3 + $0x18] sm:$0xff]  ;;  %v63_v6 = vld [vmem:[#allocation3 + $0x20] sm:$0xff]  ;;  %v64_v7 = vld [vmem:[#allocation3 + $0x28] sm:$0xff]  ;;  %212 = vst.msk [vmem:[#allocation2] sm:$0xff] %vm211_vm1, %v2115_v14  ;;  %s1817_s24 = sshll.u32 %s2883_s7, 4  ;;  %s1818_s24 = int_to_ptr.hbm [resolvable:$true] %s1817_s24 }
   0xf   :  { %145 = vmatpush.msra.mxu0 %v75_v1  ;;  %v65_v8 = vld [vmem:[#allocation3 + $0x30] sm:$0xff]  ;;  %v66_v9 = vld [vmem:[#allocation3 + $0x38] sm:$0xff]  ;;  %v67_v10 = vld [vmem:[#allocation3 + $0x40] sm:$0xff]  ;;  %213 = vst.msk [vmem:[#allocation2 + $0x8] sm:$0xff] %vm211_vm1, %v2115_v14 }
  0x10   :  { %1831 = vmatmul.msk.f32.vlgmr.msra.gmra.mxu0 %vm81_vm0, %v59_v2  ;;  %v68_v11 = vld [vmem:[#allocation3 + $0x48] sm:$0xff]  ;;  %v69_v12 = vld [vmem:[#allocation3 + $0x50] sm:$0xff]  ;;  %v70_v13 = vld [vmem:[#allocation3 + $0x58] sm:$0xff]  ;;  %214 = vst.msk [vmem:[#allocation2 + $0xa0] sm:$0xff] %vm211_vm1, %v2115_v14 }
  0x11   :  { %v71_v15 = vld [vmem:[#allocation3 + $0x60] sm:$0xff]  ;;  %215 = vst.msk [vmem:[#allocation2 + $0xa8] sm:$0xff] %vm211_vm1, %v2115_v14  ;;  %v72_v17 = vld [vmem:[#allocation3 + $0x68] sm:$0xff]  ;;  %v73_v18 = vld [vmem:[#allocation3 + $0x70] sm:$0xff] }
  0x12   :  { %217 = vst.msk [vmem:[#allocation2 + $0x90] sm:$0xff] %vm211_vm1, %v2115_v14  ;;  %v305_v16 = vld [vmem:[#allocation6 + $0x4] sm:$0xf]  ;;  %v74_v19 = vld [vmem:[#allocation3 + $0x78] sm:$0xff]  ;;  %v2257_v20 = vld [vmem:[%s2880_s4] ss:$0 sm:$0xff] }
  0x13   :  { %218 = vst.msk [vmem:[#allocation2 + $0x98] sm:$0xff] %vm211_vm1, %v2115_v14  ;;  %1847 = vmatpush.msk.msrb.mxu0 %vm354_vm2, %v305_v16  ;;  %2017 = vmatpush.msk.msra.mxu1 %vm354_vm2, %v305_v16  ;;  %v287_v25 = vld [vmem:[#allocation6] sm:$0xf]  ;;  %v556_v26 = vld [vmem:[#allocation6 + $0x8] sm:$0xf] }
  0x14   :  { %219 = vst.msk [vmem:[#allocation2 + $0x130] sm:$0xff] %vm211_vm1, %v2115_v14  ;;  %2018 = vmatpush.msk.msra.mxu2 %vm354_vm2, %v287_v25  ;;  %2019 = vmatpush.msk.msra.mxu3 %vm354_vm2, %v556_v26  ;;  %v856_v27 = vld [vmem:[#allocation6 + $0x10] sm:$0xf]  ;;  %v706_v32 = vld [vmem:[#allocation6 + $0xc] sm:$0xf] }
  0x15   :  { %220 = vst.msk [vmem:[#allocation2 + $0x138] sm:$0xff] %vm211_vm1, %v2115_v14  ;;  %1864 = vmatpush.msk.msra.mxu0 %vm354_vm2, %v287_v25  ;;  %1898 = vmatpush.msk.msrb.mxu1 %vm354_vm2, %v706_v32  ;;  %v271_v43 = vld [vmem:[#allocation2] sm:$0xff] }
  0x16   :  { %226 = vst.msk [vmem:[#allocation2 + $0x40] sm:$0x1] %vm222_vm3, %v2115_v14  ;;  %v288_v22 = vld [vmem:[#allocation2 + $0x1] sm:$0xff]  ;;  %1915 = vmatpush.msk.msrb.mxu2 %vm354_vm2, %v856_v27 }
  0x17   :  { %223 = vst.msk [vmem:[#allocation2 + $0x10] sm:$0x1] %vm222_vm3, %v2115_v14 }
  0x18   :  { %1832 = vmatmul.msk.f32.gmra.mxu0 %vm81_vm0, %v60_v3  ;;  %224 = vst.msk [vmem:[#allocation2 + $0x20] sm:$0x1] %vm222_vm3, %v2115_v14 }
  0x19   :  { %225 = vst.msk [vmem:[#allocation2 + $0x30] sm:$0x1] %vm222_vm3, %v2115_v14 }
  0x1a   :  { %227 = vst.msk [vmem:[#allocation2 + $0x50] sm:$0x1] %vm222_vm3, %v2115_v14 }
  0x1b   :  { %228 = vst.msk [vmem:[#allocation2 + $0x60] sm:$0x1] %vm222_vm3, %v2115_v14 }
  0x1c   :  { %229 = vst.msk [vmem:[#allocation2 + $0x70] sm:$0x1] %vm222_vm3, %v2115_v14 }
  0x1d   :  { %230 = vst.msk [vmem:[#allocation2 + $0x80] sm:$0x1] %vm222_vm3, %v2115_v14 }
  0x1e   :  { %231 = vst.msk [vmem:[#allocation2 + $0xb0] sm:$0x1] %vm222_vm3, %v2115_v14 }
  0x1f   :  { %232 = vst.msk [vmem:[#allocation2 + $0xc0] sm:$0x1] %vm222_vm3, %v2115_v14 }
  0x20   :  { %1833 = vmatmul.msk.f32.gmra.mxu0 %vm81_vm0, %v61_v4  ;;  %233 = vst.msk [vmem:[#allocation2 + $0xd0] sm:$0x1] %vm222_vm3, %v2115_v14 }
  0x21   :  { %234 = vst.msk [vmem:[#allocation2 + $0xe0] sm:$0x1] %vm222_vm3, %v2115_v14 }
  0x22   :  { %235 = vst.msk [vmem:[#allocation2 + $0xf0] sm:$0x1] %vm222_vm3, %v2115_v14 }
  0x23   :  { %236 = vst.msk [vmem:[#allocation2 + $0x100] sm:$0x1] %vm222_vm3, %v2115_v14 }
  0x24   :  { %237 = vst.msk [vmem:[#allocation2 + $0x110] sm:$0x1] %vm222_vm3, %v2115_v14 }
  0x25   :  { %238 = vst.msk [vmem:[#allocation2 + $0x120] sm:$0x1] %vm222_vm3, %v2115_v14 }
  0x26   :  { %239 = vst.msk [vmem:[#allocation2 + $0x19] sm:$0x1] %vm222_vm3, %v2115_v14 }
  0x27   :  { %240 = vst.msk [vmem:[#allocation2 + $0x29] sm:$0x1] %vm222_vm3, %v2115_v14 }
  0x28   :  { %1834 = vmatmul.msk.f32.gmra.mxu0 %vm81_vm0, %v62_v5  ;;  %241 = vst.msk [vmem:[#allocation2 + $0x39] sm:$0x1] %vm222_vm3, %v2115_v14 }
  0x29   :  { %242 = vst.msk [vmem:[#allocation2 + $0x49] sm:$0x1] %vm222_vm3, %v2115_v14 }
  0x2a   :  { %243 = vst.msk [vmem:[#allocation2 + $0x59] sm:$0x1] %vm222_vm3, %v2115_v14 }
  0x2b   :  { %244 = vst.msk [vmem:[#allocation2 + $0x69] sm:$0x1] %vm222_vm3, %v2115_v14 }
  0x2c   :  { %245 = vst.msk [vmem:[#allocation2 + $0x79] sm:$0x1] %vm222_vm3, %v2115_v14 }
  0x2d   :  { %246 = vst.msk [vmem:[#allocation2 + $0x89] sm:$0x1] %vm222_vm3, %v2115_v14 }
  0x2e   :  { %247 = vst.msk [vmem:[#allocation2 + $0xb9] sm:$0x1] %vm222_vm3, %v2115_v14 }
  0x2f   :  { %248 = vst.msk [vmem:[#allocation2 + $0xc9] sm:$0x1] %vm222_vm3, %v2115_v14 }
  0x30   :  { %1835 = vmatmul.msk.f32.gmra.mxu0 %vm81_vm0, %v63_v6  ;;  %249 = vst.msk [vmem:[#allocation2 + $0xd9] sm:$0x1] %vm222_vm3, %v2115_v14 }
  0x31   :  { %250 = vst.msk [vmem:[#allocation2 + $0xe9] sm:$0x1] %vm222_vm3, %v2115_v14 }
  0x32   :  { %251 = vst.msk [vmem:[#allocation2 + $0xf9] sm:$0x1] %vm222_vm3, %v2115_v14 }
  0x33   :  { %252 = vst.msk [vmem:[#allocation2 + $0x109] sm:$0x1] %vm222_vm3, %v2115_v14 }
  0x34   :  { %253 = vst.msk [vmem:[#allocation2 + $0x119] sm:$0x1] %vm222_vm3, %v2115_v14 }
  0x35   :  { %254 = vst.msk [vmem:[#allocation2 + $0x129] sm:$0x1] %vm222_vm3, %v2115_v14 }
  0x38   :  { %1836 = vmatmul.msk.f32.gmra.mxu0 %vm81_vm0, %v64_v7  ;;  %v296_v7 = vld [vmem:[#allocation2 + $0xa1] sm:$0xff] }
  0x40   :  { %1837 = vmatmul.msk.f32.gmra.mxu0 %vm81_vm0, %v65_v8  ;;  %v539_v8 = vld [vmem:[#allocation2 + $0x2] sm:$0xff] }
  0x48   :  { %1838 = vmatmul.msk.f32.gmra.mxu0 %vm81_vm0, %v66_v9 }
  0x50   :  { %1839 = vmatmul.msk.f32.gmra.mxu0 %vm81_vm0, %v67_v10  ;;  %v279_v10 = vld [vmem:[#allocation2 + $0xa0] sm:$0xff] }
  0x58   :  { %1840 = vmatmul.msk.f32.gmra.mxu0 %vm81_vm0, %v68_v11  ;;  %v547_v11 = vld [vmem:[#allocation2 + $0xa2] sm:$0xff] }
  0x60   :  { %1841 = vmatmul.msk.f32.gmra.mxu0 %vm81_vm0, %v69_v12  ;;  %v1157_v12 = vld [vmem:[#allocation6 + $0x18] sm:$0xf] }
  0x68   :  { %1842 = vmatmul.msk.f32.gmra.mxu0 %vm81_vm0, %v70_v13 }
  0x70   :  { %1843 = vmatmul.msk.f32.gmra.mxu0 %vm81_vm0, %v71_v15 }
  0x78   :  { %1844 = vmatmul.msk.f32.gmra.mxu0 %vm81_vm0, %v72_v17 }
  0x80   :  { %1845 = vmatmul.msk.f32.gmra.mxu0 %vm81_vm0, %v73_v18 }
  0x88   :  { %1846 = vmatmul.msk.f32.gmra.mxu0 %vm81_vm0, %v74_v19 }
  0x8d   :  { %v147_v21 = vpop.f32.mrf.mxu0 }
  0x8e   :  { %v148_v23 = vadd.f32 %v2257_v20, %v147_v21 }
  0x90   :  { %v195_v24 = vmax.f32 %v148_v23, 0.0  ;;  %1848 = vmatmul.msk.f32.vlgmr.msrb.gmra.mxu0 %vm211_vm1, %v288_v22 }
  0x91   :  { %1881 = vmatpush.msk.msrb.mxu0 %vm354_vm2, %v556_v26 }
  0x92   :  { %255 = vst.msk [vmem:[#allocation2 + $0x11] sm:$0xff] %vm211_vm1, %v195_v24 }
  0x95   :  { %v150_v28 = vpop.f32.mrf.mxu0 }
  0x96   :  { %v151_v29 = vadd.f32 %v2257_v20, %v150_v28 }
  0x98   :  { %v196_v30 = vmax.f32 %v151_v29, 0.0 }
  0x99   :  { %v2284_v31 = vld [vmem:[#allocation2 + $0x11] sm:$0xff] }
  0x9a   :  { %256 = vst.msk [vmem:[#allocation2 + $0x21] sm:$0xff] %vm211_vm1, %v196_v30  ;;  %1849 = vmatmul.msk.f32.gmra.mxu0 %vm211_vm1, %v2284_v31  ;;  %v2318_v51 = vld [vmem:[#allocation2 + $0x10] sm:$0xff] }
  0x9b   :  { %v2379_v16 = vld [vmem:[#allocation2 + $0x12] sm:$0xff] }
  0x9d   :  { %v153_v33 = vpop.f32.mrf.mxu0 }
  0x9e   :  { %v154_v34 = vadd.f32 %v2257_v20, %v153_v33 }
  0xa0   :  { %v197_v35 = vmax.f32 %v154_v34, 0.0 }
  0xa1   :  { %v2291_v36 = vld [vmem:[#allocation2 + $0x21] sm:$0xff] }
  0xa2   :  { %257 = vst.msk [vmem:[#allocation2 + $0x31] sm:$0xff] %vm211_vm1, %v197_v35  ;;  %1850 = vmatmul.msk.f32.gmra.mxu0 %vm211_vm1, %v2291_v36  ;;  %v2336_v58 = vld [vmem:[#allocation2 + $0x20] sm:$0xff] }
  0xa3   :  { %v2397_v24 = vld [vmem:[#allocation2 + $0x22] sm:$0xff] }
  0xa5   :  { %v156_v37 = vpop.f32.mrf.mxu0 }
  0xa6   :  { %v157_v38 = vadd.f32 %v2257_v20, %v156_v37 }
  0xa8   :  { %v198_v39 = vmax.f32 %v157_v38, 0.0  ;;  %v1006_v38 = vld [vmem:[#allocation6 + $0x14] sm:$0xf] }
  0xa9   :  { %v2297_v40 = vld [vmem:[#allocation2 + $0x31] sm:$0xff]  ;;  %1932 = vmatpush.msk.msrb.mxu3 %vm354_vm2, %v1006_v38 }
  0xaa   :  { %258 = vst.msk [vmem:[#allocation2 + $0x41] sm:$0xff] %vm211_vm1, %v198_v39  ;;  %1851 = vmatmul.msk.f32.gmra.mxu0 %vm211_vm1, %v2297_v40  ;;  %v2354_v1 = vld [vmem:[#allocation2 + $0x30] sm:$0xff] }
  0xab   :  { %v2415_v32 = vld [vmem:[#allocation2 + $0x32] sm:$0xff] }
  0xad   :  { %v159_v41 = vpop.f32.mrf.mxu0 }
  0xae   :  { %v160_v42 = vadd.f32 %v2257_v20, %v159_v41 }
  0xb0   :  { %v199_v44 = vmax.f32 %v160_v42, 0.0 }
  0xb1   :  { %v2303_v45 = vld [vmem:[#allocation2 + $0x41] sm:$0xff] }
  0xb2   :  { %v2305_v46 = vld [vmem:[#allocation2 + $0x40] sm:$0xff]  ;;  %259 = vst.msk [vmem:[#allocation2 + $0x51] sm:$0xff] %vm211_vm1, %v199_v44  ;;  %1852 = vmatmul.msk.f32.vlgmr.msra.gmra.mxu1 %vm211_vm1, %v2303_v45  ;;  %1865 = vmatmul.msk.f32.vlgmr.msra.gmra.mxu0 %vm211_vm1, %v271_v43 }
  0xb3   :  { %v2307_v47 = vld [vmem:[#allocation2 + $0x42] sm:$0xff]  ;;  %1869 = vmatmul.msk.f32.vlgmr.msra.gmra.mxu2 %vm211_vm1, %v2305_v46  ;;  %1949 = vmatpush.msk.msra.mxu0 %vm354_vm2, %v1157_v12 }
  0xb4   :  { %1886 = vmatmul.msk.f32.vlgmr.msra.gmra.mxu3 %vm211_vm1, %v2307_v47 }
  0xb5   :  { %v162_v48 = vpop.f32.mrf.mxu0 }
  0xb6   :  { %v163_v49 = vadd.f32 %v2257_v20, %v162_v48  ;;  %v1457_v48 = vld [vmem:[#allocation6 + $0x20] sm:$0xf] }
  0xb7   :  { %1983 = vmatpush.msk.msra.mxu2 %vm354_vm2, %v1457_v48 }
  0xb8   :  { %v200_v50 = vmax.f32 %v163_v49, 0.0  ;;  %v1307_v49 = vld [vmem:[#allocation6 + $0x1c] sm:$0xf] }
  0xb9   :  { %v2320_v52 = vld [vmem:[#allocation2 + $0x51] sm:$0xff]  ;;  %1966 = vmatpush.msk.msra.mxu1 %vm354_vm2, %v1307_v49 }
  0xba   :  { %v2322_v53 = vld [vmem:[#allocation2 + $0x50] sm:$0xff]  ;;  %260 = vst.msk [vmem:[#allocation2 + $0x61] sm:$0xff] %vm211_vm1, %v200_v50  ;;  %1853 = vmatmul.msk.f32.gmra.mxu1 %vm211_vm1, %v2320_v52  ;;  %1866 = vmatmul.msk.f32.gmra.mxu0 %vm211_vm1, %v2318_v51 }
  0xbb   :  { %v2324_v54 = vld [vmem:[#allocation2 + $0x52] sm:$0xff]  ;;  %1870 = vmatmul.msk.f32.gmra.mxu2 %vm211_vm1, %v2322_v53 }
  0xbc   :  { %1887 = vmatmul.msk.f32.gmra.mxu3 %vm211_vm1, %v2324_v54 }
  0xbd   :  { %v165_v55 = vpop.f32.mrf.mxu0 }
  0xbe   :  { %v166_v56 = vadd.f32 %v2257_v20, %v165_v55 }
  0xc0   :  { %v201_v57 = vmax.f32 %v166_v56, 0.0 }
  0xc1   :  { %v2338_v59 = vld [vmem:[#allocation2 + $0x61] sm:$0xff] }
  0xc2   :  { %v2340_v60 = vld [vmem:[#allocation2 + $0x60] sm:$0xff]  ;;  %261 = vst.msk [vmem:[#allocation2 + $0x71] sm:$0xff] %vm211_vm1, %v201_v57  ;;  %1854 = vmatmul.msk.f32.gmra.mxu1 %vm211_vm1, %v2338_v59  ;;  %1867 = vmatmul.msk.f32.gmra.mxu0 %vm211_vm1, %v2336_v58 }
  0xc3   :  { %v2342_v61 = vld [vmem:[#allocation2 + $0x62] sm:$0xff]  ;;  %1871 = vmatmul.msk.f32.gmra.mxu2 %vm211_vm1, %v2340_v60 }
  0xc4   :  { %1888 = vmatmul.msk.f32.gmra.mxu3 %vm211_vm1, %v2342_v61 }
  0xc5   :  { %v168_v62 = vpop.f32.mrf.mxu0 }
  0xc6   :  { %v169_v63 = vadd.f32 %v2257_v20, %v168_v62 }
  0xc8   :  { %v202_v0 = vmax.f32 %v169_v63, 0.0 }
  0xc9   :  { %v2356_v2 = vld [vmem:[#allocation2 + $0x71] sm:$0xff] }
  0xca   :  { %v2358_v3 = vld [vmem:[#allocation2 + $0x70] sm:$0xff]  ;;  %262 = vst.msk [vmem:[#allocation2 + $0x81] sm:$0xff] %vm211_vm1, %v202_v0  ;;  %1855 = vmatmul.msk.f32.gmra.mxu1 %vm211_vm1, %v2356_v2  ;;  %1868 = vmatmul.msk.f32.gmra.mxu0 %vm211_vm1, %v2354_v1 }
  0xcb   :  { %v2360_v4 = vld [vmem:[#allocation2 + $0x72] sm:$0xff]  ;;  %1872 = vmatmul.msk.f32.gmra.mxu2 %vm211_vm1, %v2358_v3 }
  0xcc   :  { %1889 = vmatmul.msk.f32.gmra.mxu3 %vm211_vm1, %v2360_v4 }
  0xcd   :  { %v171_v5 = vpop.f32.mrf.mxu0 }
  0xce   :  { %v172_v6 = vadd.f32 %v2257_v20, %v171_v5 }
  0xd0   :  { %v203_v9 = vmax.f32 %v172_v6, 0.0 }
  0xd1   :  { %v2566_v49 = vld [vmem:[#allocation2 + $0x82] sm:$0xff] }
  0xd2   :  { %263 = vst.msk [vmem:[#allocation2 + $0xb1] sm:$0xff] %vm211_vm1, %v203_v9  ;;  %1856 = vmatmul.msk.f32.gmra.mxu1 %vm211_vm1, %v296_v7  ;;  %1882 = vmatmul.msk.f32.vlgmr.msrb.gmra.mxu0 %vm211_vm1, %v539_v8 }
  0xd3   :  { %1873 = vmatmul.msk.f32.gmra.mxu2 %vm211_vm1, %v279_v10 }
  0xd4   :  { %1890 = vmatmul.msk.f32.gmra.mxu3 %vm211_vm1, %v547_v11 }
  0xd5   :  { %v174_v13 = vpop.f32.mrf.mxu0 }
  0xd6   :  { %v175_v14 = vadd.f32 %v2257_v20, %v174_v13 }
  0xd8   :  { %v204_v15 = vmax.f32 %v175_v14, 0.0 }
  0xd9   :  { %v2381_v17 = vld [vmem:[#allocation2 + $0xb1] sm:$0xff] }
  0xda   :  { %v2383_v18 = vld [vmem:[#allocation2 + $0xb0] sm:$0xff]  ;;  %264 = vst.msk [vmem:[#allocation2 + $0xc1] sm:$0xff] %vm211_vm1, %v204_v15  ;;  %1857 = vmatmul.msk.f32.gmra.mxu1 %vm211_vm1, %v2381_v17  ;;  %1883 = vmatmul.msk.f32.gmra.mxu0 %vm211_vm1, %v2379_v16 }
  0xdb   :  { %v2385_v19 = vld [vmem:[#allocation2 + $0xb2] sm:$0xff]  ;;  %1874 = vmatmul.msk.f32.gmra.mxu2 %vm211_vm1, %v2383_v18 }
  0xdc   :  { %1891 = vmatmul.msk.f32.gmra.mxu3 %vm211_vm1, %v2385_v19 }
  0xdd   :  { %v177_v21 = vpop.f32.mrf.mxu0 }
  0xde   :  { %v178_v22 = vadd.f32 %v2257_v20, %v177_v21 }
  0xe0   :  { %v205_v23 = vmax.f32 %v178_v22, 0.0 }
  0xe1   :  { %v2399_v25 = vld [vmem:[#allocation2 + $0xc1] sm:$0xff] }
  0xe2   :  { %v2401_v26 = vld [vmem:[#allocation2 + $0xc0] sm:$0xff]  ;;  %265 = vst.msk [vmem:[#allocation2 + $0xd1] sm:$0xff] %vm211_vm1, %v205_v23  ;;  %1858 = vmatmul.msk.f32.gmra.mxu1 %vm211_vm1, %v2399_v25  ;;  %1884 = vmatmul.msk.f32.gmra.mxu0 %vm211_vm1, %v2397_v24 }
  0xe3   :  { %v2403_v27 = vld [vmem:[#allocation2 + $0xc2] sm:$0xff]  ;;  %1875 = vmatmul.msk.f32.gmra.mxu2 %vm211_vm1, %v2401_v26 }
  0xe4   :  { %1892 = vmatmul.msk.f32.gmra.mxu3 %vm211_vm1, %v2403_v27 }
  0xe5   :  { %v180_v28 = vpop.f32.mrf.mxu0 }
  0xe6   :  { %v181_v29 = vadd.f32 %v2257_v20, %v180_v28 }
  0xe8   :  { %v206_v30 = vmax.f32 %v181_v29, 0.0 }
  0xe9   :  { %v2417_v33 = vld [vmem:[#allocation2 + $0xd1] sm:$0xff] }
  0xea   :  { %v2419_v34 = vld [vmem:[#allocation2 + $0xd0] sm:$0xff]  ;;  %266 = vst.msk [vmem:[#allocation2 + $0xe1] sm:$0xff] %vm211_vm1, %v206_v30  ;;  %1859 = vmatmul.msk.f32.gmra.mxu1 %vm211_vm1, %v2417_v33  ;;  %1885 = vmatmul.msk.f32.gmra.mxu0 %vm211_vm1, %v2415_v32 }
  0xeb   :  { %v2421_v35 = vld [vmem:[#allocation2 + $0xd2] sm:$0xff]  ;;  %1876 = vmatmul.msk.f32.gmra.mxu2 %vm211_vm1, %v2419_v34 }
  0xec   :  { %1893 = vmatmul.msk.f32.gmra.mxu3 %vm211_vm1, %v2421_v35 }
  0xed   :  { %v183_v37 = vpop.f32.mrf.mxu0 }
  0xee   :  { %v184_v39 = vadd.f32 %v2257_v20, %v183_v37 }
  0xf0   :  { %v207_v41 = vmax.f32 %v184_v39, 0.0 }
  0xf1   :  { %v2434_v42 = vld [vmem:[#allocation2 + $0xe1] sm:$0xff] }
  0xf2   :  { %v2436_v43 = vld [vmem:[#allocation2 + $0xe0] sm:$0xff]  ;;  %267 = vst.msk [vmem:[#allocation2 + $0xf1] sm:$0xff] %vm211_vm1, %v207_v41  ;;  %1860 = vmatmul.msk.f32.gmra.mxu1 %vm211_vm1, %v2434_v42  ;;  %1950 = vmatmul.msk.f32.vlgmr.msra.gmra.mxu0 %vm211_vm1, %v2336_v58 }
  0xf3   :  { %v2438_v44 = vld [vmem:[#allocation2 + $0xe2] sm:$0xff]  ;;  %1877 = vmatmul.msk.f32.gmra.mxu2 %vm211_vm1, %v2436_v43 }
  0xf4   :  { %1894 = vmatmul.msk.f32.gmra.mxu3 %vm211_vm1, %v2438_v44 }
  0xf5   :  { %v186_v50 = vpop.f32.mrf.mxu0 }
  0xf6   :  { %v187_v55 = vadd.f32 %v2257_v20, %v186_v50 }
  0xf8   :  { %v208_v56 = vmax.f32 %v187_v55, 0.0 }
  0xf9   :  { %v2452_v57 = vld [vmem:[#allocation2 + $0xf1] sm:$0xff] }
  0xfa   :  { %v2454_v62 = vld [vmem:[#allocation2 + $0xf0] sm:$0xff]  ;;  %268 = vst.msk [vmem:[#allocation2 + $0x101] sm:$0xff] %vm211_vm1, %v208_v56  ;;  %1861 = vmatmul.msk.f32.gmra.mxu1 %vm211_vm1, %v2452_v57  ;;  %1951 = vmatmul.msk.f32.gmra.mxu0 %vm211_vm1, %v2354_v1 }
  0xfb   :  { %v2456_v63 = vld [vmem:[#allocation2 + $0xf2] sm:$0xff]  ;;  %1878 = vmatmul.msk.f32.gmra.mxu2 %vm211_vm1, %v2454_v62 }
  0xfc   :  { %1895 = vmatmul.msk.f32.gmra.mxu3 %vm211_vm1, %v2456_v63 }
  0xfd   :  { %v189_v0 = vpop.f32.mrf.mxu0 }
  0xfe   :  { %v190_v5 = vadd.f32 %v2257_v20, %v189_v0 }
 0x100   :  { %v209_v6 = vmax.f32 %v190_v5, 0.0 }
 0x101   :  { %v2468_v7 = vld [vmem:[#allocation2 + $0x101] sm:$0xff] }
 0x102   :  { %v2470_v8 = vld [vmem:[#allocation2 + $0x100] sm:$0xff]  ;;  %269 = vst.msk [vmem:[#allocation2 + $0x111] sm:$0xff] %vm211_vm1, %v209_v6  ;;  %1862 = vmatmul.msk.f32.gmra.mxu1 %vm211_vm1, %v2468_v7  ;;  %1952 = vmatmul.msk.f32.gmra.mxu0 %vm211_vm1, %v2305_v46 }
 0x103   :  { %v2472_v9 = vld [vmem:[#allocation2 + $0x102] sm:$0xff]  ;;  %1879 = vmatmul.msk.f32.gmra.mxu2 %vm211_vm1, %v2470_v8 }
 0x104   :  { %1896 = vmatmul.msk.f32.gmra.mxu3 %vm211_vm1, %v2472_v9 }
 0x105   :  { %v192_v10 = vpop.f32.mrf.mxu0 }
 0x106   :  { %v193_v11 = vadd.f32 %v2257_v20, %v192_v10  ;;  %v1146_v20 = vld [vmem:[#allocation2 + $0x80] sm:$0xff] }
 0x108   :  { %v210_v12 = vmax.f32 %v193_v11, 0.0 }
 0x109   :  { %v2484_v13 = vld [vmem:[#allocation2 + $0x111] sm:$0xff] }
 0x10a   :  { %v2486_v14 = vld [vmem:[#allocation2 + $0x110] sm:$0xff]  ;;  %270 = vst.msk [vmem:[#allocation2 + $0x121] sm:$0xff] %vm211_vm1, %v210_v12  ;;  %1863 = vmatmul.msk.f32.gmra.mxu1 %vm211_vm1, %v2484_v13  ;;  %1953 = vmatmul.msk.f32.gmra.mxu0 %vm211_vm1, %v2322_v53 }
 0x10b   :  { %v2488_v15 = vld [vmem:[#allocation2 + $0x112] sm:$0xff]  ;;  %1880 = vmatmul.msk.f32.gmra.mxu2 %vm211_vm1, %v2486_v14 }
 0x10c   :  { %1897 = vmatmul.msk.f32.gmra.mxu3 %vm211_vm1, %v2488_v15 }
 0x112   :  { %1899 = vmatmul.msk.f32.vlgmr.msrb.gmra.mxu1 %vm211_vm1, %v2318_v51  ;;  %1954 = vmatmul.msk.f32.gmra.mxu0 %vm211_vm1, %v2340_v60 }
 0x113   :  { %1916 = vmatmul.msk.f32.vlgmr.msrb.gmra.mxu2 %vm211_vm1, %v2284_v31  ;;  %v1147_v31 = vld [vmem:[#allocation2 + $0x90] sm:$0xff] }
 0x114   :  { %1933 = vmatmul.msk.f32.vlgmr.msrb.gmra.mxu3 %vm211_vm1, %v2379_v16 }
 0x11a   :  { %1900 = vmatmul.msk.f32.gmra.mxu1 %vm211_vm1, %v2336_v58  ;;  %1955 = vmatmul.msk.f32.gmra.mxu0 %vm211_vm1, %v2358_v3 }
 0x11b   :  { %1917 = vmatmul.msk.f32.gmra.mxu2 %vm211_vm1, %v2291_v36 }
 0x11c   :  { %1934 = vmatmul.msk.f32.gmra.mxu3 %vm211_vm1, %v2397_v24 }
 0x122   :  { %1901 = vmatmul.msk.f32.gmra.mxu1 %vm211_vm1, %v2354_v1  ;;  %1956 = vmatmul.msk.f32.gmra.mxu0 %vm211_vm1, %v1146_v20 }
 0x123   :  { %1918 = vmatmul.msk.f32.gmra.mxu2 %vm211_vm1, %v2297_v40 }
 0x124   :  { %1935 = vmatmul.msk.f32.gmra.mxu3 %vm211_vm1, %v2415_v32 }
 0x12a   :  { %1902 = vmatmul.msk.f32.gmra.mxu1 %vm211_vm1, %v2305_v46  ;;  %1957 = vmatmul.msk.f32.gmra.mxu0 %vm211_vm1, %v1147_v31 }
 0x12b   :  { %1919 = vmatmul.msk.f32.gmra.mxu2 %vm211_vm1, %v2303_v45 }
 0x12c   :  { %1936 = vmatmul.msk.f32.gmra.mxu3 %vm211_vm1, %v2307_v47 }
 0x12f   :  { %v387_v51 = vpop.f32.mrf.mxu1 }
 0x132   :  { %1903 = vmatmul.msk.f32.gmra.mxu1 %vm211_vm1, %v2322_v53  ;;  %1958 = vmatmul.msk.f32.gmra.mxu0 %vm211_vm1, %v2401_v26  ;;  %v2547_v53 = vpop.f32.mrf.mxu0 }
 0x133   :  { %1920 = vmatmul.msk.f32.gmra.mxu2 %vm211_vm1, %v2320_v52 }
 0x134   :  { %1937 = vmatmul.msk.f32.gmra.mxu3 %vm211_vm1, %v2324_v54 }
 0x136   :  { %v503_v46 = vpop.f32.mrf.mxu2 }
 0x137   :  { %v637_v58 = vpop.f32.mrf.mxu3  ;;  %v504_v1 = vadd.f32 %v503_v46, %v387_v51  ;;  %v390_v16 = vpop.f32.mrf.mxu1 }
 0x139   :  { %v2537_v21 = vadd.f32 %v637_v58, %v504_v1  ;;  %v704_v58 = vld [vmem:[#allocation2 + $0x120] sm:$0xff] }
 0x13a   :  { %1904 = vmatmul.msk.f32.gmra.mxu1 %vm211_vm1, %v2340_v60  ;;  %1959 = vmatmul.msk.f32.gmra.mxu0 %vm211_vm1, %v2419_v34  ;;  %v2559_v41 = vpop.f32.mrf.mxu0 }
 0x13b   :  { %1921 = vmatmul.msk.f32.gmra.mxu2 %vm211_vm1, %v2338_v59 }
 0x13c   :  { %1938 = vmatmul.msk.f32.gmra.mxu3 %vm211_vm1, %v2342_v61 }
 0x13e   :  { %v506_v22 = vpop.f32.mrf.mxu2 }
 0x13f   :  { %v640_v23 = vpop.f32.mrf.mxu3  ;;  %v507_v28 = vadd.f32 %v506_v22, %v390_v16  ;;  %v393_v29 = vpop.f32.mrf.mxu1 }
 0x141   :  { %v2549_v30 = vadd.f32 %v640_v23, %v507_v28 }
 0x142   :  { %1905 = vmatmul.msk.f32.gmra.mxu1 %vm211_vm1, %v2358_v3  ;;  %1960 = vmatmul.msk.f32.gmra.mxu0 %vm211_vm1, %v2436_v43  ;;  %v2564_v3 = vld [vmem:[#allocation2 + $0x81] sm:$0xff]  ;;  %v2576_v6 = vpop.f32.mrf.mxu0 }
 0x143   :  { %1922 = vmatmul.msk.f32.gmra.mxu2 %vm211_vm1, %v2356_v2 }
 0x144   :  { %1939 = vmatmul.msk.f32.gmra.mxu3 %vm211_vm1, %v2360_v4 }
 0x146   :  { %v509_v60 = vpop.f32.mrf.mxu2 }
 0x147   :  { %v643_v37 = vpop.f32.mrf.mxu3  ;;  %v510_v38 = vadd.f32 %v509_v60, %v393_v29  ;;  %v396_v39 = vpop.f32.mrf.mxu1 }
 0x149   :  { %v2561_v48 = vadd.f32 %v643_v37, %v510_v38 }
 0x14a   :  { %1906 = vmatmul.msk.f32.gmra.mxu1 %vm211_vm1, %v1146_v20  ;;  %1961 = vmatmul.msk.f32.gmra.mxu0 %vm211_vm1, %v2454_v62 }
 0x14b   :  { %1923 = vmatmul.msk.f32.gmra.mxu2 %vm211_vm1, %v2564_v3 }
 0x14c   :  { %1940 = vmatmul.msk.f32.gmra.mxu3 %vm211_vm1, %v2566_v49 }
 0x14e   :  { %v512_v50 = vpop.f32.mrf.mxu2 }
 0x14f   :  { %v513_v55 = vadd.f32 %v512_v50, %v396_v39  ;;  %v399_v56 = vpop.f32.mrf.mxu1  ;;  %v646_v0 = vpop.f32.mrf.mxu3 }
 0x151   :  { %v2574_v5 = vadd.f32 %v646_v0, %v513_v55  ;;  %v2650_v0 = vld [vmem:[#allocation2 + $0x121] sm:$0xff] }
 0x152   :  { %1907 = vmatmul.msk.f32.gmra.mxu1 %vm211_vm1, %v2383_v18  ;;  %1962 = vmatmul.msk.f32.gmra.mxu0 %vm211_vm1, %v2470_v8 }
 0x153   :  { %1924 = vmatmul.msk.f32.gmra.mxu2 %vm211_vm1, %v2381_v17  ;;  %v2596_v17 = vpop.f32.mrf.mxu0 }
 0x154   :  { %1941 = vmatmul.msk.f32.gmra.mxu3 %vm211_vm1, %v2385_v19 }
 0x156   :  { %v515_v10 = vpop.f32.mrf.mxu2 }
 0x157   :  { %v2586_v11 = vadd.f32 %v515_v10, %v399_v56  ;;  %v402_v12 = vpop.f32.mrf.mxu1  ;;  %v2652_v10 = vld [vmem:[#allocation2 + $0x122] sm:$0xff] }
 0x15a   :  { %1908 = vmatmul.msk.f32.gmra.mxu1 %vm211_vm1, %v2401_v26  ;;  %1963 = vmatmul.msk.f32.gmra.mxu0 %vm211_vm1, %v2486_v14 }
 0x15b   :  { %1925 = vmatmul.msk.f32.gmra.mxu2 %vm211_vm1, %v2399_v25  ;;  %v491_v26 = vpop.f32.mrf.mxu0 }
 0x15c   :  { %1942 = vmatmul.msk.f32.gmra.mxu3 %vm211_vm1, %v2403_v27 }
 0x15e   :  { %v518_v18 = vpop.f32.mrf.mxu2 }
 0x15f   :  { %v2598_v19 = vadd.f32 %v518_v18, %v402_v12  ;;  %v405_v20 = vpop.f32.mrf.mxu1 }
 0x162   :  { %1909 = vmatmul.msk.f32.gmra.mxu1 %vm211_vm1, %v2419_v34  ;;  %1964 = vmatmul.msk.f32.gmra.mxu0 %vm211_vm1, %v704_v58 }
 0x163   :  { %1926 = vmatmul.msk.f32.gmra.mxu2 %vm211_vm1, %v2417_v33  ;;  %v494_v22 = vpop.f32.mrf.mxu0 }
 0x164   :  { %1943 = vmatmul.msk.f32.gmra.mxu3 %vm211_vm1, %v2421_v35 }
 0x166   :  { %v521_v31 = vpop.f32.mrf.mxu2 }
 0x167   :  { %v2606_v51 = vadd.f32 %v521_v31, %v405_v20  ;;  %v408_v46 = vpop.f32.mrf.mxu1 }
 0x16a   :  { %1910 = vmatmul.msk.f32.gmra.mxu1 %vm211_vm1, %v2436_v43  ;;  %v1155_v43 = vld [vmem:[#allocation2 + $0x130] sm:$0xff] }
 0x16b   :  { %1927 = vmatmul.msk.f32.gmra.mxu2 %vm211_vm1, %v2434_v42  ;;  %1965 = vmatmul.msk.f32.gmra.mxu0 %vm211_vm1, %v1155_v43  ;;  %v2626_v60 = vpop.f32.mrf.mxu0 }
 0x16c   :  { %1944 = vmatmul.msk.f32.gmra.mxu3 %vm211_vm1, %v2438_v44 }
 0x16e   :  { %v524_v34 = vpop.f32.mrf.mxu2 }
 0x16f   :  { %v2615_v1 = vadd.f32 %v524_v34, %v408_v46  ;;  %v411_v16 = vpop.f32.mrf.mxu1 }
 0x172   :  { %1911 = vmatmul.msk.f32.gmra.mxu1 %vm211_vm1, %v2454_v62  ;;  %v1626_v62 = vld [vmem:[%s2879_s3] sm:$0xf] }
 0x173   :  { %1928 = vmatmul.msk.f32.gmra.mxu2 %vm211_vm1, %v2452_v57  ;;  %2000 = vmatpush.msk.msra.mxu3 %vm354_vm2, %v1626_v62 }
 0x174   :  { %1945 = vmatmul.msk.f32.gmra.mxu3 %vm211_vm1, %v2456_v63 }
 0x176   :  { %v527_v23 = vpop.f32.mrf.mxu2 }
 0x177   :  { %v2624_v28 = vadd.f32 %v527_v23, %v411_v16  ;;  %v414_v29 = vpop.f32.mrf.mxu1 }
 0x17a   :  { %1912 = vmatmul.msk.f32.gmra.mxu1 %vm211_vm1, %v2470_v8  ;;  %v2646_v8 = vpop.f32.mrf.mxu0 }
 0x17b   :  { %1929 = vmatmul.msk.f32.gmra.mxu2 %vm211_vm1, %v2468_v7 }
 0x17c   :  { %1946 = vmatmul.msk.f32.gmra.mxu3 %vm211_vm1, %v2472_v9 }
 0x17e   :  { %v530_v37 = vpop.f32.mrf.mxu2 }
 0x17f   :  { %v2638_v38 = vadd.f32 %v530_v37, %v414_v29  ;;  %v417_v39 = vpop.f32.mrf.mxu1  ;;  %v649_v37 = vpop.f32.mrf.mxu3 }
 0x182   :  { %1913 = vmatmul.msk.f32.gmra.mxu1 %vm211_vm1, %v2486_v14  ;;  %v492_v14 = vadd.f32 %v491_v26, %v2547_v53  ;;  %v625_v12 = vpop.f32.mrf.mxu0  ;;  %v495_v53 = vadd.f32 %v494_v22, %v2559_v41 }
 0x183   :  { %1930 = vmatmul.msk.f32.gmra.mxu2 %vm211_vm1, %v2484_v13 }
 0x184   :  { %1947 = vmatmul.msk.f32.gmra.mxu3 %vm211_vm1, %v2488_v15  ;;  %v673_v46 = vadd.f32 %v625_v12, %v492_v14 }
 0x186   :  { %v533_v50 = vpop.f32.mrf.mxu2 }
 0x187   :  { %v2648_v55 = vadd.f32 %v533_v50, %v417_v39  ;;  %v420_v56 = vpop.f32.mrf.mxu1  ;;  %v652_v22 = vpop.f32.mrf.mxu3 }
 0x18a   :  { %1914 = vmatmul.msk.f32.gmra.mxu1 %vm211_vm1, %v704_v58  ;;  %v628_v23 = vpop.f32.mrf.mxu0 }
 0x18b   :  { %1931 = vmatmul.msk.f32.gmra.mxu2 %vm211_vm1, %v2650_v0  ;;  %v674_v26 = vadd.f32 %v628_v23, %v495_v53  ;;  %v682_v53 = vadd.f32 %v652_v22, %v2598_v19 }
 0x18c   :  { %1948 = vmatmul.msk.f32.gmra.mxu3 %vm211_vm1, %v2652_v10 }
 0x18e   :  { %v536_v18 = vpop.f32.mrf.mxu2 }
 0x18f   :  { %v2660_v20 = vadd.f32 %v536_v18, %v420_v56  ;;  %v775_v31 = vpop.f32.mrf.mxu1 }
 0x190   :  { %v823_v58 = vadd.f32 %v775_v31, %v673_v46 }
 0x192   :  { %1967 = vmatmul.msk.f32.vlgmr.msra.gmra.mxu1 %vm211_vm1, %v2291_v36  ;;  %v631_v19 = vpop.f32.mrf.mxu0 }
 0x193   :  { %1984 = vmatmul.msk.f32.vlgmr.msra.gmra.mxu2 %vm211_vm1, %v2397_v24 }
 0x196   :  { %v925_v34 = vpop.f32.mrf.mxu2 }
 0x197   :  { %v2666_v16 = vadd.f32 %v925_v34, %v823_v58  ;;  %v778_v43 = vpop.f32.mrf.mxu1 }
 0x198   :  { %v824_v29 = vadd.f32 %v778_v43, %v674_v26 }
 0x19a   :  { %1968 = vmatmul.msk.f32.gmra.mxu1 %vm211_vm1, %v2297_v40 }
 0x19b   :  { %1985 = vmatmul.msk.f32.gmra.mxu2 %vm211_vm1, %v2415_v32 }
 0x19e   :  { %v928_v36 = vpop.f32.mrf.mxu2 }
 0x19f   :  { %v2673_v62 = vadd.f32 %v928_v36, %v824_v29  ;;  %v2675_v24 = vpop.f32.mrf.mxu1 }
 0x1a2   :  { %1969 = vmatmul.msk.f32.gmra.mxu1 %vm211_vm1, %v2303_v45  ;;  %v655_v45 = vpop.f32.mrf.mxu3 }
 0x1a3   :  { %1986 = vmatmul.msk.f32.gmra.mxu2 %vm211_vm1, %v2307_v47 }
 0x1a6   :  { %v2681_v41 = vpop.f32.mrf.mxu2 }
 0x1a7   :  { %v2683_v40 = vpop.f32.mrf.mxu1 }
 0x1aa   :  { %1970 = vmatmul.msk.f32.gmra.mxu1 %vm211_vm1, %v2320_v52 }
 0x1ab   :  { %1987 = vmatmul.msk.f32.gmra.mxu2 %vm211_vm1, %v2324_v54  ;;  %v658_v54 = vpop.f32.mrf.mxu3 }
 0x1ae   :  { %v2689_v32 = vpop.f32.mrf.mxu2 }
 0x1af   :  { %v787_v39 = vpop.f32.mrf.mxu1 }
 0x1b0   :  { %v827_v47 = vadd.f32 %v787_v39, %v2537_v21 }
 0x1b2   :  { %1971 = vmatmul.msk.f32.gmra.mxu1 %vm211_vm1, %v2338_v59 }
 0x1b3   :  { %1988 = vmatmul.msk.f32.gmra.mxu2 %vm211_vm1, %v2342_v61  ;;  %v661_v46 = vpop.f32.mrf.mxu3 }
 0x1b6   :  { %v937_v50 = vpop.f32.mrf.mxu2 }
 0x1b7   :  { %v2696_v56 = vadd.f32 %v937_v50, %v827_v47  ;;  %v790_v14 = vpop.f32.mrf.mxu1 }
 0x1b8   :  { %v828_v52 = vadd.f32 %v790_v14, %v2549_v30  ;;  %v1447_v30 = vld [vmem:[#allocation2 + $0x92] sm:$0xff] }
 0x1ba   :  { %1972 = vmatmul.msk.f32.gmra.mxu1 %vm211_vm1, %v2356_v2 }
 0x1bb   :  { %1989 = vmatmul.msk.f32.gmra.mxu2 %vm211_vm1, %v2360_v4  ;;  %v1297_v4 = vld [vmem:[#allocation2 + $0x91] sm:$0xff]  ;;  %v664_v23 = vpop.f32.mrf.mxu3 }
 0x1be   :  { %v940_v59 = vpop.f32.mrf.mxu2 }
 0x1bf   :  { %v2703_v12 = vadd.f32 %v940_v59, %v828_v52  ;;  %v793_v61 = vpop.f32.mrf.mxu1 }
 0x1c0   :  { %v829_v21 = vadd.f32 %v793_v61, %v2561_v48  ;;  %v686_v61 = vadd.f32 %v664_v23, %v2638_v38 }
 0x1c2   :  { %1973 = vmatmul.msk.f32.gmra.mxu1 %vm211_vm1, %v2564_v3  ;;  %v681_v3 = vadd.f32 %v649_v37, %v2586_v11  ;;  %v683_v37 = vadd.f32 %v655_v45, %v2606_v51  ;;  %v2743_v45 = vpop.f32.mrf.mxu0 }
 0x1c3   :  { %1990 = vmatmul.msk.f32.gmra.mxu2 %vm211_vm1, %v2566_v49  ;;  %v667_v11 = vpop.f32.mrf.mxu3 }
 0x1c6   :  { %v943_v18 = vpop.f32.mrf.mxu2 }
 0x1c7   :  { %v2710_v2 = vadd.f32 %v943_v18, %v829_v21  ;;  %v796_v31 = vpop.f32.mrf.mxu1 }
 0x1c8   :  { %v830_v58 = vadd.f32 %v796_v31, %v2574_v5 }
 0x1ca   :  { %1974 = vmatmul.msk.f32.gmra.mxu1 %vm211_vm1, %v1297_v4 }
 0x1cb   :  { %1991 = vmatmul.msk.f32.gmra.mxu2 %vm211_vm1, %v1447_v30  ;;  %v670_v22 = vpop.f32.mrf.mxu3 }
 0x1ce   :  { %v946_v34 = vpop.f32.mrf.mxu2 }
 0x1cf   :  { %v2716_v43 = vadd.f32 %v946_v34, %v830_v58  ;;  %v799_v49 = vpop.f32.mrf.mxu1 }
 0x1d0   :  { %v831_v48 = vadd.f32 %v799_v49, %v681_v3 }
 0x1d2   :  { %1975 = vmatmul.msk.f32.gmra.mxu1 %vm211_vm1, %v2399_v25 }
 0x1d3   :  { %1992 = vmatmul.msk.f32.gmra.mxu2 %vm211_vm1, %v2403_v27 }
 0x1d6   :  { %v949_v26 = vpop.f32.mrf.mxu2 }
 0x1d7   :  { %v2723_v29 = vadd.f32 %v949_v26, %v831_v48  ;;  %v802_v5 = vpop.f32.mrf.mxu1  ;;  %v1455_v48 = vld [vmem:[#allocation2 + $0x132] sm:$0xff] }
 0x1d8   :  { %v832_v36 = vadd.f32 %v802_v5, %v682_v53 }
 0x1da   :  { %1976 = vmatmul.msk.f32.gmra.mxu1 %vm211_vm1, %v2417_v33  ;;  %v684_v33 = vadd.f32 %v658_v54, %v2615_v1  ;;  %v1075_v54 = vpop.f32.mrf.mxu3 }
 0x1db   :  { %1993 = vmatmul.msk.f32.gmra.mxu2 %vm211_vm1, %v2421_v35  ;;  %v1123_v26 = vadd.f32 %v1075_v54, %v2666_v16 }
 0x1de   :  { %v952_v25 = vpop.f32.mrf.mxu2 }
 0x1df   :  { %v2730_v39 = vadd.f32 %v952_v25, %v832_v36  ;;  %v805_v27 = vpop.f32.mrf.mxu1  ;;  %v2779_v25 = vld [vmem:[%s2881_s5] ss:$0 sm:$0xff] }
 0x1e0   :  { %v833_v47 = vadd.f32 %v805_v27, %v683_v37 }
 0x1e2   :  { %1977 = vmatmul.msk.f32.gmra.mxu1 %vm211_vm1, %v2434_v42  ;;  %v685_v42 = vadd.f32 %v661_v46, %v2624_v28  ;;  %v1078_v31 = vpop.f32.mrf.mxu3 }
 0x1e3   :  { %1994 = vmatmul.msk.f32.gmra.mxu2 %vm211_vm1, %v2438_v44 }
 0x1e6   :  { %v955_v50 = vpop.f32.mrf.mxu2 }
 0x1e7   :  { %v2737_v35 = vadd.f32 %v955_v50, %v833_v47  ;;  %v808_v14 = vpop.f32.mrf.mxu1 }
 0x1e8   :  { %v834_v51 = vadd.f32 %v808_v14, %v684_v33  ;;  %v1124_v33 = vadd.f32 %v1078_v31, %v2673_v62 }
 0x1ea   :  { %1978 = vmatmul.msk.f32.gmra.mxu1 %vm211_vm1, %v2452_v57  ;;  %v1226_v57 = vpop.f32.mrf.mxu0  ;;  %v1081_v58 = vpop.f32.mrf.mxu3 }
 0x1eb   :  { %1995 = vmatmul.msk.f32.gmra.mxu2 %vm211_vm1, %v2456_v63 }
 0x1ee   :  { %v958_v52 = vpop.f32.mrf.mxu2 }
 0x1ef   :  { %v2746_v44 = vadd.f32 %v958_v52, %v834_v51  ;;  %v811_v1 = vpop.f32.mrf.mxu1  ;;  %v501_v52 = vadd.f32 %v2646_v8, %v2596_v17 }
 0x1f0   :  { %v835_v59 = vadd.f32 %v811_v1, %v685_v42 }
 0x1f1   :  { %v676_v62 = vadd.f32 %v2743_v45, %v501_v52 }
 0x1f2   :  { %1979 = vmatmul.msk.f32.gmra.mxu1 %vm211_vm1, %v2468_v7  ;;  %v687_v7 = vadd.f32 %v667_v11, %v2648_v55  ;;  %v1229_v30 = vpop.f32.mrf.mxu0  ;;  %v1305_v55 = vld [vmem:[#allocation2 + $0x131] sm:$0xff]  ;;  %v1084_v53 = vpop.f32.mrf.mxu3  ;;  %v498_v11 = vadd.f32 %v2626_v60, %v2576_v6 }
 0x1f3   :  { %1996 = vmatmul.msk.f32.gmra.mxu2 %vm211_vm1, %v2472_v9  ;;  %v1275_v60 = vadd.f32 %v1229_v30, %v1124_v33 }
 0x1f4   :  { %v675_v47 = vadd.f32 %v631_v19, %v498_v11 }
 0x1f6   :  { %v961_v63 = vpop.f32.mrf.mxu2  ;;  %v825_v14 = vadd.f32 %v2675_v24, %v675_v47  ;;  %v826_v24 = vadd.f32 %v2683_v40, %v676_v62 }
 0x1f7   :  { %v2753_v21 = vadd.f32 %v961_v63, %v835_v59  ;;  %v814_v18 = vpop.f32.mrf.mxu1 }
 0x1f8   :  { %v836_v28 = vadd.f32 %v814_v18, %v686_v61  ;;  %v975_v42 = vadd.f32 %v2681_v41, %v825_v14  ;;  %v976_v18 = vadd.f32 %v2689_v32, %v826_v24 }
 0x1fa   :  { %1980 = vmatmul.msk.f32.gmra.mxu1 %vm211_vm1, %v2484_v13  ;;  %v688_v13 = vadd.f32 %v670_v22, %v2660_v20  ;;  %v1232_v23 = vpop.f32.mrf.mxu0  ;;  %v1274_v20 = vadd.f32 %v1226_v57, %v1123_v26  ;;  %v1087_v50 = vpop.f32.mrf.mxu3  ;;  %v1125_v59 = vadd.f32 %v1081_v58, %v975_v42 }
 0x1fb   :  { %1997 = vmatmul.msk.f32.gmra.mxu2 %vm211_vm1, %v2488_v15  ;;  %v1127_v32 = vadd.f32 %v1087_v50, %v2696_v56 }
 0x1fc   :  { %v1276_v31 = vadd.f32 %v1232_v23, %v1125_v59 }
 0x1fe   :  { %v964_v4 = vpop.f32.mrf.mxu2 }
 0x1ff   :  { %v2760_v46 = vadd.f32 %v964_v4, %v836_v28  ;;  %v817_v9 = vpop.f32.mrf.mxu1 }
 0x200   :  { %v837_v38 = vadd.f32 %v817_v9, %v687_v7  ;;  %v1126_v7 = vadd.f32 %v1084_v53, %v976_v18 }
 0x202   :  { %1981 = vmatmul.msk.f32.gmra.mxu1 %vm211_vm1, %v2650_v0  ;;  %v1235_v36 = vpop.f32.mrf.mxu0  ;;  %v1090_v41 = vpop.f32.mrf.mxu3 }
 0x203   :  { %1998 = vmatmul.msk.f32.gmra.mxu2 %vm211_vm1, %v2652_v10  ;;  %v1277_v58 = vadd.f32 %v1235_v36, %v1126_v7 }
 0x206   :  { %v967_v3 = vpop.f32.mrf.mxu2 }
 0x207   :  { %v2767_v34 = vadd.f32 %v967_v3, %v837_v38  ;;  %v820_v15 = vpop.f32.mrf.mxu1 }
 0x208   :  { %v838_v49 = vadd.f32 %v820_v15, %v688_v13 }
 0x20a   :  { %1982 = vmatmul.msk.f32.gmra.mxu1 %vm211_vm1, %v1305_v55  ;;  %v1238_v19 = vpop.f32.mrf.mxu0  ;;  %v1093_v40 = vpop.f32.mrf.mxu3 }
 0x20b   :  { %1999 = vmatmul.msk.f32.gmra.mxu2 %vm211_vm1, %v1455_v48  ;;  %v1278_v53 = vadd.f32 %v1238_v19, %v1127_v32 }
 0x20e   :  { %v970_v0 = vpop.f32.mrf.mxu2 }
 0x20f   :  { %v2772_v10 = vadd.f32 %v970_v0, %v838_v49  ;;  %v1376_v5 = vpop.f32.mrf.mxu1 }
 0x210   :  { %v1424_v37 = vadd.f32 %v1376_v5, %v1274_v20  ;;  %v1128_v20 = vadd.f32 %v1090_v41, %v2703_v12 }
 0x212   :  { %v1241_v45 = vpop.f32.mrf.mxu0  ;;  %v1096_v26 = vpop.f32.mrf.mxu3 }
 0x213   :  { %v1279_v56 = vadd.f32 %v1241_v45, %v1128_v20  ;;  %v1130_v19 = vadd.f32 %v1096_v26, %v2716_v43 }
 0x216   :  { %v1526_v27 = vpop.f32.mrf.mxu2 }
 0x217   :  { %v1574_v22 = vadd.f32 %v1526_v27, %v1424_v37  ;;  %v1379_v16 = vpop.f32.mrf.mxu1 }
 0x218   :  { %v1425_v1 = vadd.f32 %v1379_v16, %v1275_v60  ;;  %v1129_v16 = vadd.f32 %v1093_v40, %v2710_v2 }
 0x219   :  { %v1594_v51 = vadd.f32 %v2779_v25, %v1574_v22 }
 0x21a   :  { %v1244_v48 = vpop.f32.mrf.mxu0 }
 0x21b   :  { %v1610_v6 = vmax.f32 %v1594_v51, 0.0  ;;  %v1099_v51 = vpop.f32.mrf.mxu3  ;;  %v1280_v12 = vadd.f32 %v1244_v48, %v1129_v16 }
 0x21c   :  { %v1131_v41 = vadd.f32 %v1099_v51, %v2723_v29 }
 0x21d   :  { %2001 = vmatmul.msk.f32.vlgmr.msra.gmra.mxu3 %vm211_vm1, %v1610_v6 }
 0x21e   :  { %v1529_v54 = vpop.f32.mrf.mxu2 }
 0x21f   :  { %v1575_v57 = vadd.f32 %v1529_v54, %v1425_v1  ;;  %v1382_v61 = vpop.f32.mrf.mxu1 }
 0x220   :  { %v1426_v17 = vadd.f32 %v1382_v61, %v1276_v31 }
 0x221   :  { %v1595_v63 = vadd.f32 %v2779_v25, %v1575_v57 }
 0x222   :  { %v1247_v47 = vpop.f32.mrf.mxu0 }
 0x223   :  { %v1611_v28 = vmax.f32 %v1595_v63, 0.0  ;;  %v1102_v57 = vpop.f32.mrf.mxu3  ;;  %v1281_v61 = vadd.f32 %v1247_v47, %v1130_v19 }
 0x224   :  { %v1132_v45 = vadd.f32 %v1102_v57, %v2730_v39 }
 0x225   :  { %2002 = vmatmul.msk.f32.gmra.mxu3 %vm211_vm1, %v1611_v28 }
 0x226   :  { %v1532_v8 = vpop.f32.mrf.mxu2 }
 0x227   :  { %v1576_v4 = vadd.f32 %v1532_v8, %v1426_v17  ;;  %v1385_v9 = vpop.f32.mrf.mxu1 }
 0x228   :  { %v1427_v13 = vadd.f32 %v1385_v9, %v1277_v58 }
 0x229   :  { %v1596_v30 = vadd.f32 %v2779_v25, %v1576_v4 }
 0x22a   :  { %v1250_v52 = vpop.f32.mrf.mxu0 }
 0x22b   :  { %v1612_v38 = vmax.f32 %v1596_v30, 0.0  ;;  %v1282_v43 = vadd.f32 %v1250_v52, %v1131_v41  ;;  %v1105_v7 = vpop.f32.mrf.mxu3 }
 0x22d   :  { %2003 = vmatmul.msk.f32.gmra.mxu3 %vm211_vm1, %v1612_v38 }
 0x22e   :  { %v1535_v3 = vpop.f32.mrf.mxu2 }
 0x22f   :  { %v1577_v15 = vadd.f32 %v1535_v3, %v1427_v13  ;;  %v1388_v55 = vpop.f32.mrf.mxu1 }
 0x230   :  { %v1428_v0 = vadd.f32 %v1388_v55, %v1278_v53  ;;  %v1133_v55 = vadd.f32 %v1105_v7, %v2737_v35 }
 0x231   :  { %v1597_v49 = vadd.f32 %v2779_v25, %v1577_v15 }
 0x232   :  { %v1253_v31 = vpop.f32.mrf.mxu0 }
 0x233   :  { %v1613_v23 = vmax.f32 %v1597_v49, 0.0  ;;  %v1283_v13 = vadd.f32 %v1253_v31, %v1132_v45  ;;  %v1108_v32 = vpop.f32.mrf.mxu3 }
 0x234   :  { %v1134_v20 = vadd.f32 %v1108_v32, %v2746_v44 }
 0x235   :  { %2004 = vmatmul.msk.f32.gmra.mxu3 %vm211_vm1, %v1613_v23 }
 0x236   :  { %v1538_v5 = vpop.f32.mrf.mxu2 }
 0x237   :  { %v1578_v36 = vadd.f32 %v1538_v5, %v1428_v0  ;;  %v1391_v11 = vpop.f32.mrf.mxu1 }
 0x238   :  { %v1429_v33 = vadd.f32 %v1391_v11, %v1279_v56 }
 0x239   :  { %v1598_v37 = vadd.f32 %v2779_v25, %v1578_v36 }
 0x23a   :  { %v1256_v40 = vpop.f32.mrf.mxu0 }
 0x23b   :  { %v1614_v27 = vmax.f32 %v1598_v37, 0.0  ;;  %v1284_v39 = vadd.f32 %v1256_v40, %v1133_v55  ;;  %v1111_v37 = vpop.f32.mrf.mxu3 }
 0x23c   :  { %v1135_v16 = vadd.f32 %v1111_v37, %v2753_v21 }
 0x23d   :  { %2005 = vmatmul.msk.f32.gmra.mxu3 %vm211_vm1, %v1614_v27 }
 0x23e   :  { %v1541_v22 = vpop.f32.mrf.mxu2 }
 0x23f   :  { %v1579_v50 = vadd.f32 %v1541_v22, %v1429_v33  ;;  %v1394_v14 = vpop.f32.mrf.mxu1 }
 0x240   :  { %v1430_v60 = vadd.f32 %v1394_v14, %v1280_v12 }
 0x241   :  { %v1599_v42 = vadd.f32 %v2779_v25, %v1579_v50 }
 0x242   :  { %v1259_v0 = vpop.f32.mrf.mxu0 }
 0x243   :  { %v1615_v6 = vmax.f32 %v1599_v42, 0.0  ;;  %v1285_v35 = vadd.f32 %v1259_v0, %v1134_v20  ;;  %v1114_v42 = vpop.f32.mrf.mxu3 }
 0x244   :  { %v1136_v52 = vadd.f32 %v1114_v42, %v2760_v46  ;;  %v1752_v42 = vld [vmem:[#allocation3 + $0x28] sm:$0xff] }
 0x245   :  { %2006 = vmatmul.msk.f32.gmra.mxu3 %vm211_vm1, %v1615_v6 }
 0x246   :  { %v1544_v1 = vpop.f32.mrf.mxu2 }
 0x247   :  { %v1580_v54 = vadd.f32 %v1544_v1, %v1430_v60  ;;  %v1397_v62 = vpop.f32.mrf.mxu1 }
 0x248   :  { %v1431_v24 = vadd.f32 %v1397_v62, %v1281_v61 }
 0x249   :  { %v1600_v59 = vadd.f32 %v2779_v25, %v1580_v54 }
 0x24a   :  { %v1262_v33 = vpop.f32.mrf.mxu0 }
 0x24b   :  { %v1616_v2 = vmax.f32 %v1600_v59, 0.0  ;;  %v1286_v6 = vadd.f32 %v1262_v33, %v1135_v16  ;;  %v1117_v57 = vpop.f32.mrf.mxu3 }
 0x24d   :  { %2007 = vmatmul.msk.f32.gmra.mxu3 %vm211_vm1, %v1616_v2 }
 0x24e   :  { %v1547_v63 = vpop.f32.mrf.mxu2 }
 0x24f   :  { %v1581_v18 = vadd.f32 %v1547_v63, %v1431_v24  ;;  %v1400_v28 = vpop.f32.mrf.mxu1  ;;  %v1137_v24 = vadd.f32 %v1117_v57, %v2767_v34 }
 0x250   :  { %v1432_v4 = vadd.f32 %v1400_v28, %v1282_v43 }
 0x251   :  { %v1601_v17 = vadd.f32 %v2779_v25, %v1581_v18 }
 0x252   :  { %v1265_v54 = vpop.f32.mrf.mxu0 }
 0x253   :  { %v1617_v8 = vmax.f32 %v1601_v17, 0.0  ;;  %v1287_v21 = vadd.f32 %v1265_v54, %v1136_v52  ;;  %v1753_v52 = vld [vmem:[#allocation3 + $0x30] sm:$0xff] }
 0x255   :  { %2008 = vmatmul.msk.f32.gmra.mxu3 %vm211_vm1, %v1617_v8  ;;  %v1120_v8 = vpop.f32.mrf.mxu3 }
 0x256   :  { %v1550_v9 = vpop.f32.mrf.mxu2  ;;  %v1138_v7 = vadd.f32 %v1120_v8, %v2772_v10  ;;  %v2836_v10 = vld [vmem:[%s2882_s6] ss:$0 sm:$0xff]  ;;  %s2116_s6 = smov [#allocation8]  }
 0x257   :  { %v1582_v30 = vadd.f32 %v1550_v9, %v1432_v4  ;;  %v1403_v38 = vpop.f32.mrf.mxu1  ;;  %s1815_s21 = sshll.u32 %s2116_s6, 4  ;;  %s1816_s21 = int_to_ptr.vmem [resolvable:$true] %s1815_s21 }
 0x258   :  { %v1433_v3 = vadd.f32 %v1403_v38, %v1283_v13 }
 0x259   :  { %v1602_v58 = vadd.f32 %v2779_v25, %v1582_v30 }
 0x25a   :  { %v1268_v41 = vpop.f32.mrf.mxu0 }
 0x25b   :  { %v1618_v29 = vmax.f32 %v1602_v58, 0.0  ;;  %v1288_v46 = vadd.f32 %v1268_v41, %v1137_v24  ;;  %v1755_v24 = vld [vmem:[#allocation3 + $0x40] sm:$0xff] }
 0x25d   :  { %2009 = vmatmul.msk.f32.gmra.mxu3 %vm211_vm1, %v1618_v29 }
 0x25e   :  { %v1553_v15 = vpop.f32.mrf.mxu2 }
 0x25f   :  { %v1583_v49 = vadd.f32 %v1553_v15, %v1433_v3  ;;  %v1406_v48 = vpop.f32.mrf.mxu1  ;;  %v1747_v15 = vld [vmem:[#allocation3] sm:$0xff] }
 0x260   :  { %v1434_v26 = vadd.f32 %v1406_v48, %v1284_v39 }
 0x261   :  { %v1603_v23 = vadd.f32 %v2779_v25, %v1583_v49 }
 0x262   :  { %v1271_v9 = vpop.f32.mrf.mxu0 }
 0x263   :  { %v1619_v53 = vmax.f32 %v1603_v23, 0.0  ;;  %v1289_v34 = vadd.f32 %v1271_v9, %v1138_v7  ;;  %v1757_v7 = vld [vmem:[#allocation3 + $0x50] sm:$0xff] }
 0x265   :  { %2010 = vmatmul.msk.f32.gmra.mxu3 %vm211_vm1, %v1619_v53  ;;  %v1748_v53 = vld [vmem:[#allocation3 + $0x8] sm:$0xff] }
 0x266   :  { %v1556_v5 = vpop.f32.mrf.mxu2 }
 0x267   :  { %v1584_v36 = vadd.f32 %v1556_v5, %v1434_v26  ;;  %v1409_v11 = vpop.f32.mrf.mxu1  ;;  %v1749_v5 = vld [vmem:[#allocation3 + $0x10] sm:$0xff] }
 0x268   :  { %v1435_v47 = vadd.f32 %v1409_v11, %v1285_v35 }
 0x269   :  { %v1604_v27 = vadd.f32 %v2779_v25, %v1584_v36 }
 0x26b   :  { %v1620_v56 = vmax.f32 %v1604_v27, 0.0  ;;  %v1750_v27 = vld [vmem:[#allocation3 + $0x18] sm:$0xff] }
 0x26d   :  { %2011 = vmatmul.msk.f32.gmra.mxu3 %vm211_vm1, %v1620_v56 }
 0x26e   :  { %v1559_v22 = vpop.f32.mrf.mxu2 }
 0x26f   :  { %v1585_v50 = vadd.f32 %v1559_v22, %v1435_v47  ;;  %v1412_v14 = vpop.f32.mrf.mxu1  ;;  %v1751_v22 = vld [vmem:[#allocation3 + $0x20] sm:$0xff] }
 0x270   :  { %v1436_v12 = vadd.f32 %v1412_v14, %v1286_v6 }
 0x271   :  { %v1605_v51 = vadd.f32 %v2779_v25, %v1585_v50 }
 0x273   :  { %v1621_v44 = vmax.f32 %v1605_v51, 0.0 }
 0x275   :  { %2012 = vmatmul.msk.f32.gmra.mxu3 %vm211_vm1, %v1621_v44 }
 0x276   :  { %v1562_v60 = vpop.f32.mrf.mxu2 }
 0x277   :  { %v1586_v1 = vadd.f32 %v1562_v60, %v1436_v12  ;;  %v1415_v19 = vpop.f32.mrf.mxu1 }
 0x278   :  { %v1437_v2 = vadd.f32 %v1415_v19, %v1287_v21 }
 0x279   :  { %v1606_v62 = vadd.f32 %v2779_v25, %v1586_v1 }
 0x27b   :  { %v1622_v59 = vmax.f32 %v1606_v62, 0.0 }
 0x27d   :  { %2013 = vmatmul.msk.f32.gmra.mxu3 %vm211_vm1, %v1622_v59  ;;  %v1754_v59 = vld [vmem:[#allocation3 + $0x38] sm:$0xff] }
 0x27e   :  { %v1565_v61 = vpop.f32.mrf.mxu2 }
 0x27f   :  { %v1587_v63 = vadd.f32 %v1565_v61, %v1437_v2  ;;  %v1418_v18 = vpop.f32.mrf.mxu1 }
 0x280   :  { %v1438_v17 = vadd.f32 %v1418_v18, %v1288_v46  ;;  %v1756_v46 = vld [vmem:[#allocation3 + $0x48] sm:$0xff] }
 0x281   :  { %v1607_v28 = vadd.f32 %v2779_v25, %v1587_v63 }
 0x283   :  { %v1623_v31 = vmax.f32 %v1607_v28, 0.0 }
 0x285   :  { %2014 = vmatmul.msk.f32.gmra.mxu3 %vm211_vm1, %v1623_v31 }
 0x286   :  { %v1568_v43 = vpop.f32.mrf.mxu2 }
 0x287   :  { %v1588_v4 = vadd.f32 %v1568_v43, %v1438_v17  ;;  %v1421_v30 = vpop.f32.mrf.mxu1 }
 0x288   :  { %v1439_v58 = vadd.f32 %v1421_v30, %v1289_v34  ;;  %v1758_v34 = vld [vmem:[#allocation3 + $0x58] sm:$0xff] }
 0x289   :  { %v1608_v45 = vadd.f32 %v2779_v25, %v1588_v4 }
 0x28b   :  { %v1624_v38 = vmax.f32 %v1608_v45, 0.0 }
 0x28d   :  { %2015 = vmatmul.msk.f32.gmra.mxu3 %vm211_vm1, %v1624_v38 }
 0x28e   :  { %v1571_v40 = vpop.f32.mrf.mxu2 }
 0x28f   :  { %v1589_v29 = vadd.f32 %v1571_v40, %v1439_v58 }
 0x291   :  { %v1609_v13 = vadd.f32 %v2779_v25, %v1589_v29 }
 0x293   :  { %v1625_v3 = vmax.f32 %v1609_v13, 0.0  ;;  %v1759_v13 = vld [vmem:[#allocation3 + $0x60] sm:$0xff] }
 0x295   :  { %2016 = vmatmul.msk.f32.gmra.mxu3 %vm211_vm1, %v1625_v3 }
 0x2a0   :  { %v1699_v32 = vpop.f32.mrf.mxu3 }
 0x2a1   :  { %v1700_v55 = vadd.f32 %v2836_v10, %v1699_v32 }
 0x2a3   :  { %v1763_v49 = vadd.f32 %v1747_v15, %v1700_v55 }
 0x2a5   :  { %v1779_v48 = vmax.f32 %v1763_v49, 0.0  ;;  %v1760_v49 = vld [vmem:[#allocation3 + $0x68] sm:$0xff] }
 0x2a7   :  { %1795 = vst.msk [vmem:[#allocation8] sm:$0xff] %vm81_vm0, %v1779_v48 }
 0x2a8   :  { %v1702_v23 = vpop.f32.mrf.mxu3 }
 0x2a9   :  { %v1703_v25 = vadd.f32 %v2836_v10, %v1702_v23 }
 0x2ab   :  { %v1764_v39 = vadd.f32 %v1748_v53, %v1703_v25 }
 0x2ad   :  { %v1780_v0 = vmax.f32 %v1764_v39, 0.0  ;;  %v1761_v39 = vld [vmem:[#allocation3 + $0x70] sm:$0xff] }
 0x2af   :  { %1796 = vst.msk [vmem:[#allocation8 + $0x8] sm:$0xff] %vm81_vm0, %v1780_v0 }
 0x2b0   :  { %v1705_v26 = vpop.f32.mrf.mxu3 }
 0x2b1   :  { %v1706_v20 = vadd.f32 %v2836_v10, %v1705_v26 }
 0x2b3   :  { %v1765_v36 = vadd.f32 %v1749_v5, %v1706_v20 }
 0x2b5   :  { %v1781_v11 = vmax.f32 %v1765_v36, 0.0  ;;  %v1762_v36 = vld [vmem:[#allocation3 + $0x78] sm:$0xff] }
 0x2b7   :  { %1797 = vst.msk [vmem:[#allocation8 + $0x10] sm:$0xff] %vm81_vm0, %v1781_v11 }
 0x2b8   :  { %v1708_v37 = vpop.f32.mrf.mxu3 }
 0x2b9   :  { %v1709_v56 = vadd.f32 %v2836_v10, %v1708_v37 }
 0x2bb   :  { %v1766_v35 = vadd.f32 %v1750_v27, %v1709_v56 }
 0x2bd   :  { %v1782_v47 = vmax.f32 %v1766_v35, 0.0 }
 0x2bf   :  { %1798 = vst.msk [vmem:[#allocation8 + $0x18] sm:$0xff] %vm81_vm0, %v1782_v47 }
 0x2c0   :  { %v1711_v33 = vpop.f32.mrf.mxu3 }
 0x2c1   :  { %v1712_v16 = vadd.f32 %v2836_v10, %v1711_v33 }
 0x2c3   :  { %v1767_v50 = vadd.f32 %v1751_v22, %v1712_v16 }
 0x2c5   :  { %v1783_v14 = vmax.f32 %v1767_v50, 0.0 }
 0x2c7   :  { %1799 = vst.msk [vmem:[#allocation8 + $0x20] sm:$0xff] %vm81_vm0, %v1783_v14 }
 0x2c8   :  { %v1714_v51 = vpop.f32.mrf.mxu3 }
 0x2c9   :  { %v1715_v44 = vadd.f32 %v2836_v10, %v1714_v51 }
 0x2cb   :  { %v1768_v6 = vadd.f32 %v1752_v42, %v1715_v44 }
 0x2cd   :  { %v1784_v12 = vmax.f32 %v1768_v6, 0.0 }
 0x2cf   :  { %1800 = vst.msk [vmem:[#allocation8 + $0x28] sm:$0xff] %vm81_vm0, %v1784_v12 }
 0x2d0   :  { %v1717_v60 = vpop.f32.mrf.mxu3 }
 0x2d1   :  { %v1718_v1 = vadd.f32 %v2836_v10, %v1717_v60 }
 0x2d3   :  { %v1769_v19 = vadd.f32 %v1753_v52, %v1718_v1 }
 0x2d5   :  { %v1785_v54 = vmax.f32 %v1769_v19, 0.0 }
 0x2d7   :  { %1801 = vst.msk [vmem:[#allocation8 + $0x30] sm:$0xff] %vm81_vm0, %v1785_v54 }
 0x2d8   :  { %v1720_v62 = vpop.f32.mrf.mxu3 }
 0x2d9   :  { %v1721_v21 = vadd.f32 %v2836_v10, %v1720_v62 }
 0x2db   :  { %v1770_v57 = vadd.f32 %v1754_v59, %v1721_v21 }
 0x2dd   :  { %v1786_v2 = vmax.f32 %v1770_v57, 0.0 }
 0x2df   :  { %1802 = vst.msk [vmem:[#allocation8 + $0x38] sm:$0xff] %vm81_vm0, %v1786_v2 }
 0x2e0   :  { %v1723_v61 = vpop.f32.mrf.mxu3 }
 0x2e1   :  { %v1724_v63 = vadd.f32 %v2836_v10, %v1723_v61 }
 0x2e3   :  { %v1771_v41 = vadd.f32 %v1755_v24, %v1724_v63 }
 0x2e5   :  { %v1787_v18 = vmax.f32 %v1771_v41, 0.0 }
 0x2e7   :  { %1803 = vst.msk [vmem:[#allocation8 + $0x40] sm:$0xff] %vm81_vm0, %v1787_v18 }
 0x2e8   :  { %v1726_v28 = vpop.f32.mrf.mxu3 }
 0x2e9   :  { %v1727_v31 = vadd.f32 %v2836_v10, %v1726_v28 }
 0x2eb   :  { %v1772_v17 = vadd.f32 %v1756_v46, %v1727_v31 }
 0x2ed   :  { %v1788_v8 = vmax.f32 %v1772_v17, 0.0 }
 0x2ef   :  { %1804 = vst.msk [vmem:[#allocation8 + $0x48] sm:$0xff] %vm81_vm0, %v1788_v8 }
 0x2f0   :  { %v1729_v43 = vpop.f32.mrf.mxu3 }
 0x2f1   :  { %v1730_v4 = vadd.f32 %v2836_v10, %v1729_v43 }
 0x2f3   :  { %v1773_v9 = vadd.f32 %v1757_v7, %v1730_v4 }
 0x2f5   :  { %v1789_v45 = vmax.f32 %v1773_v9, 0.0 }
 0x2f7   :  { %1805 = vst.msk [vmem:[#allocation8 + $0x50] sm:$0xff] %vm81_vm0, %v1789_v45 }
 0x2f8   :  { %v1732_v30 = vpop.f32.mrf.mxu3 }
 0x2f9   :  { %v1733_v38 = vadd.f32 %v2836_v10, %v1732_v30 }
 0x2fb   :  { %v1774_v58 = vadd.f32 %v1758_v34, %v1733_v38 }
 0x2fd   :  { %v1790_v40 = vmax.f32 %v1774_v58, 0.0 }
 0x2ff   :  { %1806 = vst.msk [vmem:[#allocation8 + $0x58] sm:$0xff] %vm81_vm0, %v1790_v40 }
 0x300   :  { %v1735_v29 = vpop.f32.mrf.mxu3 }
 0x301   :  { %v1736_v3 = vadd.f32 %v2836_v10, %v1735_v29 }
 0x303   :  { %v1775_v32 = vadd.f32 %v1759_v13, %v1736_v3 }
 0x305   :  { %v1791_v15 = vmax.f32 %v1775_v32, 0.0 }
 0x307   :  { %1807 = vst.msk [vmem:[#allocation8 + $0x60] sm:$0xff] %vm81_vm0, %v1791_v15 }
 0x308   :  { %v1738_v55 = vpop.f32.mrf.mxu3 }
 0x309   :  { %v1739_v48 = vadd.f32 %v2836_v10, %v1738_v55 }
 0x30b   :  { %v1776_v23 = vadd.f32 %v1760_v49, %v1739_v48 }
 0x30d   :  { %v1792_v53 = vmax.f32 %v1776_v23, 0.0 }
 0x30f   :  { %1808 = vst.msk [vmem:[#allocation8 + $0x68] sm:$0xff] %vm81_vm0, %v1792_v53 }
 0x310   :  { %v1741_v25 = vpop.f32.mrf.mxu3 }
 0x311   :  { %v1742_v0 = vadd.f32 %v2836_v10, %v1741_v25 }
 0x313   :  { %v1777_v26 = vadd.f32 %v1761_v39, %v1742_v0 }
 0x315   :  { %v1793_v5 = vmax.f32 %v1777_v26, 0.0 }
 0x317   :  { %1809 = vst.msk [vmem:[#allocation8 + $0x70] sm:$0xff] %vm81_vm0, %v1793_v5 }
 0x318   :  { %v1744_v20 = vpop.f32.mrf.mxu3 }
 0x319   :  { %v1745_v11 = vadd.f32 %v2836_v10, %v1744_v20 }
 0x31b   :  { %v1778_v37 = vadd.f32 %v1762_v36, %v1745_v11 }
 0x31d   :  { %v1794_v27 = vmax.f32 %v1778_v37, 0.0 }
 0x31f   :  { %1810 = vst.msk [vmem:[#allocation8 + $0x78] sm:$0xff] %vm81_vm0, %v1794_v27 }
 0x320   :  { %1823 = dma.vmem_to_hbm [thread:$0]  %s1816_s21, 2048, %s1818_s24, [#allocation5], %s2110_s9, %s2110_s9, %s2111_s10  }
 0x321   :  { %2107 = dma.done.wait [#allocation5], 2048  }
 0x322   :  { %2108 = vsyncadd [#allocation5], 4294965248 }
 0x323   :  { %1828 = vsyncpa [#allocation4], 1 }
 0x324   :  { %1829 = vsyncpa [#allocation7], 1 }
 0x325   :  { %1830 = vsyncpa [#allocation5], 1 }

</bundles_post_ra>
